<compile_context>
chip_gen: v6e
topology: v6e:2x2x1
jax: 0.10.0
libtpu: 0.0.40
codegen_flags: <defaults>
</compile_context>

<pallas_src>
import functools

import jax
import jax.numpy as jnp
from jax.experimental import pallas as pl
from jax.experimental.pallas import tpu as pltpu


# ----------------------------------------------------------------------------
# Model constants (mirror the PyTorch module).
# ----------------------------------------------------------------------------
FILTERS = [24, 36, 48, 64, 64]
FEATURE_VEC_SIZE = 256
DEFAULT_M_DIM = 4
DEFAULT_A_DIM = 1
BN_EPS = 1e-5

LANE = 128          # lane width / channel padding target
CH_PAD = 128        # stored channel count for all conv activations
SUBLANE = 8


def _round_up(x, m):
    return ((x + m - 1) // m) * m


# ----------------------------------------------------------------------------
# Pallas kernel 1: out = relu(x @ w + b)  (BN scale/bias pre-folded into w, b).
# x, w are bf16 (MXU operands); accumulation + epilogue in f32; output bf16.
# ----------------------------------------------------------------------------
def _matmul_bias_relu_kernel(x_ref, w_ref, b_ref, o_ref):
    acc = jnp.dot(x_ref[...], w_ref[...], preferred_element_type=jnp.float32)
    o_ref[...] = jnp.maximum(acc + b_ref[...], 0.0).astype(o_ref.dtype)


def matmul_bias_relu(x, w, b):
    """x: (M, K) bf16, w: (K, N) bf16, b: (1, N) f32 -> (Mp, N) bf16 (rows padded to 8)."""
    M, K = x.shape
    Kw, N = w.shape
    assert K == Kw, (K, Kw)
    Mp = _round_up(M, SUBLANE)
    if Mp != M:
        x = jnp.pad(x, ((0, Mp - M), (0, 0)))
    # At most two row tiles: single step when tiny (low per-step overhead),
    # two "parallel" steps otherwise (lets v7x engage both TensorCores).
    if Mp >= 2 * SUBLANE and (Mp // 2) % SUBLANE == 0:
        tm = Mp // 2
    else:
        tm = Mp
    grid = (Mp // tm,)
    cost = pl.CostEstimate(
        flops=2 * Mp * K * N,
        transcendentals=0,
        bytes_accessed=Mp * K * 2 + K * N * 2 + N * 4 + Mp * N * 2,
    )
    return pl.pallas_call(
        _matmul_bias_relu_kernel,
        out_shape=jax.ShapeDtypeStruct((Mp, N), jnp.bfloat16),
        grid=grid,
        in_specs=[
            pl.BlockSpec((tm, K), lambda i: (i, 0)),
            pl.BlockSpec((K, N), lambda i: (0, 0)),
            pl.BlockSpec((1, N), lambda i: (0, 0)),
        ],
        out_specs=pl.BlockSpec((tm, N), lambda i: (i, 0)),
        compiler_params=pltpu.CompilerParams(dimension_semantics=("parallel",)),
        cost_estimate=cost,
    )(x, w, b)


# ----------------------------------------------------------------------------
# Pallas kernel 2: fused "head" = encoder fc1 + whole actor, VMEM-resident.
#   f    = relu(flat @ Wfc + bfc)
#   attn = sigmoid(m @ Wm + bm)
#   h    = f * attn ; 3x relu(Linear) ; out = tanh(Linear)
# All weights padded to 128-lane widths; padded columns stay exactly zero.
# ----------------------------------------------------------------------------
def _head_kernel(flat_ref, m_ref, fcw_ref, fcb_ref, mw_ref, mb_ref,
                 w1_ref, b1_ref, w2_ref, b2_ref, w3_ref, b3_ref,
                 w4_ref, b4_ref, o_ref):
    f32 = jnp.float32
    bf16 = jnp.bfloat16
    # encoder fc1 + ReLU
    f = jnp.maximum(
        jnp.dot(flat_ref[...], fcw_ref[...], preferred_element_type=f32) + fcb_ref[...],
        0.0)
    # actor attention gate
    z = jnp.dot(m_ref[...], mw_ref[...], preferred_element_type=f32) + mb_ref[...]
    attn = 1.0 / (1.0 + jnp.exp(-z))
    h = (f * attn).astype(bf16)
    h = jnp.maximum(jnp.dot(h, w1_ref[...], preferred_element_type=f32) + b1_ref[...], 0.0).astype(bf16)
    h = jnp.maximum(jnp.dot(h, w2_ref[...], preferred_element_type=f32) + b2_ref[...], 0.0).astype(bf16)
    h = jnp.maximum(jnp.dot(h, w3_ref[...], preferred_element_type=f32) + b3_ref[...], 0.0).astype(bf16)
    o_ref[...] = jnp.tanh(jnp.dot(h, w4_ref[...], preferred_element_type=f32) + b4_ref[...])


# ----------------------------------------------------------------------------
# Glue: im2col for 3x3 / stride-2 / pad-1 conv in NHWC (channel axis stays last,
# so the lane dim is never permuted; just 9 strided slices + one concat).
# Feature index = (ky*3 + kx) * C + c   (matches the weight layout below).
# ----------------------------------------------------------------------------
def im2col_nhwc(x):
    n, h, w, c = x.shape
    ho = (h - 1) // 2 + 1
    wo = (w - 1) // 2 + 1
    xp = jnp.pad(x, ((0, 0), (1, 1), (1, 1), (0, 0)))
    taps = []
    for ky in range(3):
        for kx in range(3):
            taps.append(
                jax.lax.slice(
                    xp,
                    (0, ky, kx, 0),
                    (n, ky + 2 * (ho - 1) + 1, kx + 2 * (wo - 1) + 1, c),
                    (1, 2, 2, 1),
                )
            )
    col = jnp.concatenate(taps, axis=-1)            # (n, ho, wo, 9*c)
    return col.reshape(n * ho * wo, 9 * c), ho, wo


# ----------------------------------------------------------------------------
# Parameter construction (mirrors nn.Module __init__ shapes / default inits).
# ----------------------------------------------------------------------------
def init_params(key, image_dim, maneuver_dim=DEFAULT_M_DIM, action_dim=DEFAULT_A_DIM):
    def uniform(k, shape, fan_in):
        bound = 1.0 / jnp.sqrt(jnp.asarray(fan_in, jnp.float32))
        return jax.random.uniform(k, shape, jnp.float32, -bound, bound)

    c_in, h, w = image_dim
    params = {"convs": []}
    chans = [c_in] + FILTERS
    for i in range(len(FILTERS)):
        key, k1, k2 = jax.random.split(key, 3)
        cin, cout = chans[i], chans[i + 1]
        params["convs"].append(dict(
            weight=uniform(k1, (cout, cin, 3, 3), cin * 9),
            bias=uniform(k2, (cout,), cin * 9),
            gamma=jnp.ones((cout,), jnp.float32),          # BatchNorm2d defaults
            beta=jnp.zeros((cout,), jnp.float32),
            running_mean=jnp.zeros((cout,), jnp.float32),
            running_var=jnp.ones((cout,), jnp.float32),
        ))
        h = (h - 1) // 2 + 1
        w = (w - 1) // 2 + 1
    conv_out = FILTERS[-1] * h * w

    def linear(k, out_f, in_f):
        k, k1, k2 = jax.random.split(k, 3)
        return k, dict(weight=uniform(k1, (out_f, in_f), in_f),
                       bias=uniform(k2, (out_f,), in_f))

    key, params["fc1"] = linear(key, FEATURE_VEC_SIZE, conv_out)
    key, params["fcm"] = linear(key, FEATURE_VEC_SIZE, maneuver_dim)
    key, params["a_fc1"] = linear(key, 100, FEATURE_VEC_SIZE)
    key, params["a_fc2"] = linear(key, 50, 100)
    key, params["a_fc3"] = linear(key, 10, 50)
    key, params["a_fc4"] = linear(key, action_dim, 10)
    return params


def prepare_params(params, image_dim, maneuver_dim=DEFAULT_M_DIM):
    """Fold BN into conv weights, transpose + zero-pad everything into
    lane-dense, MXU-ready matrices (bf16 operands, f32 biases). Runs once."""
    c_in, h, w = image_dim
    kp = {"convs": []}
    cstored = c_in                                  # channels as stored in NHWC activation
    for p in params["convs"]:
        cout, cin, kh, kw = p["weight"].shape
        inv_std = 1.0 / jnp.sqrt(p["running_var"] + BN_EPS)
        scale = p["gamma"] * inv_std
        bias = p["beta"] + (p["bias"] - p["running_mean"]) * scale
        wt = (p["weight"] * scale[:, None, None, None]).transpose(2, 3, 1, 0)  # (3,3,cin,cout)
        wt = wt.reshape(kh * kw, cin, cout)
        wt = jnp.pad(wt, ((0, 0), (0, cstored - cin), (0, CH_PAD - cout)))
        k_real = kh * kw * cstored
        k_pad = _round_up(k_real, LANE)
        w_mat = jnp.pad(wt.reshape(k_real, CH_PAD), ((0, k_pad - k_real), (0, 0)))
        kp["convs"].append(dict(
            w=w_mat.astype(jnp.bfloat16),
            b=jnp.pad(bias, (0, CH_PAD - cout)).reshape(1, CH_PAD).astype(jnp.float32),
        ))
        cstored = CH_PAD
        h = (h - 1) // 2 + 1
        w = (w - 1) // 2 + 1

    # encoder fc1 (flatten layout depends on final spatial size)
    conv_out = FILTERS[-1] * h * w
    if h * w == 1:
        fcw = jnp.pad(params["fc1"]["weight"].T, ((0, CH_PAD - conv_out), (0, 0)))
    else:
        k_fc = _round_up(conv_out, LANE)
        fcw = jnp.pad(params["fc1"]["weight"].T, ((0, k_fc - conv_out), (0, 0)))
    kp["fc1_w"] = fcw.astype(jnp.bfloat16)                               # (Kp, 256)
    kp["fc1_b"] = params["fc1"]["bias"].reshape(1, -1).astype(jnp.float32)

    def lin(p, k_pad, n_pad):
        wT = p["weight"].T                                               # (in, out)
        wT = jnp.pad(wT, ((0, k_pad - wT.shape[0]), (0, n_pad - wT.shape[1])))
        b = jnp.pad(p["bias"], (0, n_pad - p["bias"].shape[0])).reshape(1, n_pad)
        return wT.astype(jnp.bfloat16), b.astype(jnp.float32)

    a_n = _round_up(params["a_fc4"]["weight"].shape[0], LANE)
    kp["fcm_w"], kp["fcm_b"] = lin(params["fcm"], _round_up(maneuver_dim, LANE), FEATURE_VEC_SIZE)
    kp["a1_w"], kp["a1_b"] = lin(params["a_fc1"], FEATURE_VEC_SIZE, LANE)
    kp["a2_w"], kp["a2_b"] = lin(params["a_fc2"], LANE, LANE)
    kp["a3_w"], kp["a3_b"] = lin(params["a_fc3"], LANE, LANE)
    kp["a4_w"], kp["a4_b"] = lin(params["a_fc4"], LANE, a_n)
    return kp


# ----------------------------------------------------------------------------
# Forward pass: TinycarCombo(x, m) = actor(encoder(x), m)
# ----------------------------------------------------------------------------
@functools.partial(jax.jit, static_argnames=("action_dim",))
def tinycar_combo_forward(kparams, x, m, *, action_dim=DEFAULT_A_DIM):
    """x: (N, C, H, W) f32, m: (N, m_dim) f32 -> (N, action_dim) f32."""
    n = x.shape[0]
    # single layout change: NCHW -> NHWC, bf16 MXU operands
    act = jnp.transpose(x, (0, 2, 3, 1)).astype(jnp.bfloat16)

    for layer in kparams["convs"]:
        col, ho, wo = im2col_nhwc(act)
        k_pad = layer["w"].shape[0]
        if col.shape[1] < k_pad:                    # only layer 1 (K: 27 -> 128)
            col = jnp.pad(col, ((0, 0), (0, k_pad - col.shape[1])))
        y = matmul_bias_relu(col, layer["w"], layer["b"])     # (Mp, 128) bf16
        act = y[: n * ho * wo].reshape(n, ho, wo, CH_PAD)

    # flatten (matches torch .flatten(start_dim=1) on NCHW)
    hf, wf = act.shape[1], act.shape[2]
    k_fc = kparams["fc1_w"].shape[0]
    if hf * wf == 1:
        flat = act.reshape(n, CH_PAD)
    else:
        flat = act[..., :FILTERS[-1]].transpose(0, 3, 1, 2).reshape(n, -1)
        flat = jnp.pad(flat, ((0, 0), (0, k_fc - flat.shape[1])))

    np_rows = _round_up(n, SUBLANE)
    flat = jnp.pad(flat, ((0, np_rows - n), (0, 0))).astype(jnp.bfloat16)
    m_pad = jnp.pad(m.astype(jnp.bfloat16),
                    ((0, np_rows - n), (0, kparams["fcm_w"].shape[0] - m.shape[1])))

    out = pl.pallas_call(
        _head_kernel,
        out_shape=jax.ShapeDtypeStruct((np_rows, kparams["a4_w"].shape[1]), jnp.float32),
    )(flat, m_pad,
      kparams["fc1_w"], kparams["fc1_b"], kparams["fcm_w"], kparams["fcm_b"],
      kparams["a1_w"], kparams["a1_b"], kparams["a2_w"], kparams["a2_b"],
      kparams["a3_w"], kparams["a3_b"], kparams["a4_w"], kparams["a4_b"])
    return out[:n, :action_dim]


if __name__ == "__main__":
    image_dim = (3, 32, 32)            # (C, H, W); 32 -> 16 -> 8 -> 4 -> 2 -> 1
    maneuver_dim = DEFAULT_M_DIM       # 4
    action_dim = DEFAULT_A_DIM         # 1
    batch = 2

    key = jax.random.PRNGKey(0)
    key, kx, km = jax.random.split(key, 3)
    x = jax.random.normal(kx, (batch,) + image_dim, dtype=jnp.float32)
    m = jax.random.normal(km, (batch, maneuver_dim), dtype=jnp.float32)

    params = init_params(key, image_dim, maneuver_dim, action_dim)
    kparams = prepare_params(params, image_dim, maneuver_dim)

    out = tinycar_combo_forward(kparams, x, m, action_dim=action_dim)
    out = jax.block_until_ready(out)
    assert out.shape == (batch, action_dim), out.shape
    assert bool(jnp.all(jnp.isfinite(out)))
    assert bool(jnp.all(jnp.abs(out) <= 1.0))   # tanh output range
    print("KERNEL_OK")
</pallas_src>

<mosaic_0001>
module attributes {stable_mosaic.version = 11 : i64} {
  func.func @_matmul_bias_relu_kernel(%arg0: i32, %arg1: memref<256x128xbf16, #tpu.memory_space<vmem>>, %arg2: memref<128x128xbf16, #tpu.memory_space<vmem>>, %arg3: memref<1x128xf32, #tpu.memory_space<vmem>>, %arg4: memref<256x128xbf16, #tpu.memory_space<vmem>>) attributes {dimension_semantics = [#tpu.dimension_semantics<parallel>], iteration_bounds = array<i64: 2>, scalar_prefetch = 0 : i64, scratch_operands = 0 : i64, tpu.core_type = #tpu.core_type<tc>, window_params = [{transform_indices = @transform_0, window_bounds = array<i64: 256, 128>}, {pipeline_mode = #tpu.pipeline_mode<synchronous>, transform_indices = @transform_1, window_bounds = array<i64: 128, 128>}, {pipeline_mode = #tpu.pipeline_mode<synchronous>, transform_indices = @transform_2, window_bounds = array<i64: 1, 128>}, {transform_indices = @transform_3, window_bounds = array<i64: 256, 128>}]} {
    %c0 = arith.constant 0 : index
    %c0_0 = arith.constant 0 : index
    %0 = vector.load %arg1[%c0, %c0_0] : memref<256x128xbf16, #tpu.memory_space<vmem>>, vector<256x128xbf16>
    %c0_1 = arith.constant 0 : index
    %c0_2 = arith.constant 0 : index
    %1 = vector.load %arg2[%c0_1, %c0_2] : memref<128x128xbf16, #tpu.memory_space<vmem>>, vector<128x128xbf16>
    %cst = arith.constant dense<0.000000e+00> : vector<256x128xf32>
    %2 = tpu.matmul %0, %1, %cst {dimension_numbers = #tpu.dot_dimension_numbers<[1], [0], [0], [1], [0, 0, 1, 1], [], []>} : vector<256x128xbf16>, vector<128x128xbf16>, vector<256x128xf32> -> vector<256x128xf32>
    %c0_3 = arith.constant 0 : index
    %c0_4 = arith.constant 0 : index
    %3 = vector.load %arg3[%c0_3, %c0_4] : memref<1x128xf32, #tpu.memory_space<vmem>>, vector<1x128xf32>
    %4 = vector.broadcast %3 : vector<1x128xf32> to vector<256x128xf32>
    %5 = arith.addf %2, %4 : vector<256x128xf32>
    %cst_5 = arith.constant 0.000000e+00 : f32
    %6 = vector.broadcast %cst_5 : f32 to vector<256x128xf32>
    %7 = arith.maximumf %5, %6 : vector<256x128xf32>
    %8 = arith.truncf %7 : vector<256x128xf32> to vector<256x128xbf16>
    %c0_6 = arith.constant 0 : index
    %c0_7 = arith.constant 0 : index
    %9 = vector.load %arg4[%c0_6, %c0_7] : memref<256x128xbf16, #tpu.memory_space<vmem>>, vector<256x128xbf16>
    tpu.vector_store %arg4[%c0_6, %c0_7], %8 {strides = array<i32>} : memref<256x128xbf16, #tpu.memory_space<vmem>>, vector<256x128xbf16>,
    return
  }
  func.func @transform_0(%arg0: i32) -> (i32, i32) {
    %c0_i32 = arith.constant 0 : i32
    %c0_i32_0 = arith.constant 0 : i32
    return %arg0, %c0_i32 : i32, i32
  }
  func.func @transform_1(%arg0: i32) -> (i32, i32) {
    %c0_i32 = arith.constant 0 : i32
    %c0_i32_0 = arith.constant 0 : i32
    %c0_i32_1 = arith.constant 0 : i32
    return %c0_i32, %c0_i32_0 : i32, i32
  }
  func.func @transform_2(%arg0: i32) -> (i32, i32) {
    %c0_i32 = arith.constant 0 : i32
    %c0_i32_0 = arith.constant 0 : i32
    %c0_i32_1 = arith.constant 0 : i32
    return %c0_i32, %c0_i32_0 : i32, i32
  }
  func.func @transform_3(%arg0: i32) -> (i32, i32) {
    %c0_i32 = arith.constant 0 : i32
    %c0_i32_0 = arith.constant 0 : i32
    return %arg0, %c0_i32 : i32, i32
  }
}

module attributes {stable_mosaic.version = 11 : i64} {
  func.func @_matmul_bias_relu_kernel(%arg0: i32, %arg1: memref<64x1152xbf16, #tpu.memory_space<vmem>>, %arg2: memref<1152x128xbf16, #tpu.memory_space<vmem>>, %arg3: memref<1x128xf32, #tpu.memory_space<vmem>>, %arg4: memref<64x128xbf16, #tpu.memory_space<vmem>>) attributes {dimension_semantics = [#tpu.dimension_semantics<parallel>], iteration_bounds = array<i64: 2>, scalar_prefetch = 0 : i64, scratch_operands = 0 : i64, tpu.core_type = #tpu.core_type<tc>, window_params = [{transform_indices = @transform_0, window_bounds = array<i64: 64, 1152>}, {pipeline_mode = #tpu.pipeline_mode<synchronous>, transform_indices = @transform_1, window_bounds = array<i64: 1152, 128>}, {pipeline_mode = #tpu.pipeline_mode<synchronous>, transform_indices = @transform_2, window_bounds = array<i64: 1, 128>}, {transform_indices = @transform_3, window_bounds = array<i64: 64, 128>}]} {
    %c0 = arith.constant 0 : index
    %c0_0 = arith.constant 0 : index
    %0 = vector.load %arg1[%c0, %c0_0] : memref<64x1152xbf16, #tpu.memory_space<vmem>>, vector<64x1152xbf16>
    %c0_1 = arith.constant 0 : index
    %c0_2 = arith.constant 0 : index
    %1 = vector.load %arg2[%c0_1, %c0_2] : memref<1152x128xbf16, #tpu.memory_space<vmem>>, vector<1152x128xbf16>
    %cst = arith.constant dense<0.000000e+00> : vector<64x128xf32>
    %2 = tpu.matmul %0, %1, %cst {dimension_numbers = #tpu.dot_dimension_numbers<[1], [0], [0], [1], [0, 0, 1, 1], [], []>} : vector<64x1152xbf16>, vector<1152x128xbf16>, vector<64x128xf32> -> vector<64x128xf32>
    %c0_3 = arith.constant 0 : index
    %c0_4 = arith.constant 0 : index
    %3 = vector.load %arg3[%c0_3, %c0_4] : memref<1x128xf32, #tpu.memory_space<vmem>>, vector<1x128xf32>
    %4 = vector.broadcast %3 : vector<1x128xf32> to vector<64x128xf32>
    %5 = arith.addf %2, %4 : vector<64x128xf32>
    %cst_5 = arith.constant 0.000000e+00 : f32
    %6 = vector.broadcast %cst_5 : f32 to vector<64x128xf32>
    %7 = arith.maximumf %5, %6 : vector<64x128xf32>
    %8 = arith.truncf %7 : vector<64x128xf32> to vector<64x128xbf16>
    %c0_6 = arith.constant 0 : index
    %c0_7 = arith.constant 0 : index
    %9 = vector.load %arg4[%c0_6, %c0_7] : memref<64x128xbf16, #tpu.memory_space<vmem>>, vector<64x128xbf16>
    tpu.vector_store %arg4[%c0_6, %c0_7], %8 {strides = array<i32>} : memref<64x128xbf16, #tpu.memory_space<vmem>>, vector<64x128xbf16>,
    return
  }
  func.func @transform_0(%arg0: i32) -> (i32, i32) {
    %c0_i32 = arith.constant 0 : i32
    %c0_i32_0 = arith.constant 0 : i32
    return %arg0, %c0_i32 : i32, i32
  }
  func.func @transform_1(%arg0: i32) -> (i32, i32) {
    %c0_i32 = arith.constant 0 : i32
    %c0_i32_0 = arith.constant 0 : i32
    %c0_i32_1 = arith.constant 0 : i32
    return %c0_i32, %c0_i32_0 : i32, i32
  }
  func.func @transform_2(%arg0: i32) -> (i32, i32) {
    %c0_i32 = arith.constant 0 : i32
    %c0_i32_0 = arith.constant 0 : i32
    %c0_i32_1 = arith.constant 0 : i32
    return %c0_i32, %c0_i32_0 : i32, i32
  }
  func.func @transform_3(%arg0: i32) -> (i32, i32) {
    %c0_i32 = arith.constant 0 : i32
    %c0_i32_0 = arith.constant 0 : i32
    return %arg0, %c0_i32 : i32, i32
  }
}

module attributes {stable_mosaic.version = 11 : i64} {
  func.func @_matmul_bias_relu_kernel(%arg0: i32, %arg1: memref<16x1152xbf16, #tpu.memory_space<vmem>>, %arg2: memref<1152x128xbf16, #tpu.memory_space<vmem>>, %arg3: memref<1x128xf32, #tpu.memory_space<vmem>>, %arg4: memref<16x128xbf16, #tpu.memory_space<vmem>>) attributes {dimension_semantics = [#tpu.dimension_semantics<parallel>], iteration_bounds = array<i64: 2>, scalar_prefetch = 0 : i64, scratch_operands = 0 : i64, tpu.core_type = #tpu.core_type<tc>, window_params = [{transform_indices = @transform_0, window_bounds = array<i64: 16, 1152>}, {pipeline_mode = #tpu.pipeline_mode<synchronous>, transform_indices = @transform_1, window_bounds = array<i64: 1152, 128>}, {pipeline_mode = #tpu.pipeline_mode<synchronous>, transform_indices = @transform_2, window_bounds = array<i64: 1, 128>}, {transform_indices = @transform_3, window_bounds = array<i64: 16, 128>}]} {
    %c0 = arith.constant 0 : index
    %c0_0 = arith.constant 0 : index
    %0 = vector.load %arg1[%c0, %c0_0] : memref<16x1152xbf16, #tpu.memory_space<vmem>>, vector<16x1152xbf16>
    %c0_1 = arith.constant 0 : index
    %c0_2 = arith.constant 0 : index
    %1 = vector.load %arg2[%c0_1, %c0_2] : memref<1152x128xbf16, #tpu.memory_space<vmem>>, vector<1152x128xbf16>
    %cst = arith.constant dense<0.000000e+00> : vector<16x128xf32>
    %2 = tpu.matmul %0, %1, %cst {dimension_numbers = #tpu.dot_dimension_numbers<[1], [0], [0], [1], [0, 0, 1, 1], [], []>} : vector<16x1152xbf16>, vector<1152x128xbf16>, vector<16x128xf32> -> vector<16x128xf32>
    %c0_3 = arith.constant 0 : index
    %c0_4 = arith.constant 0 : index
    %3 = vector.load %arg3[%c0_3, %c0_4] : memref<1x128xf32, #tpu.memory_space<vmem>>, vector<1x128xf32>
    %4 = vector.broadcast %3 : vector<1x128xf32> to vector<16x128xf32>
    %5 = arith.addf %2, %4 : vector<16x128xf32>
    %cst_5 = arith.constant 0.000000e+00 : f32
    %6 = vector.broadcast %cst_5 : f32 to vector<16x128xf32>
    %7 = arith.maximumf %5, %6 : vector<16x128xf32>
    %8 = arith.truncf %7 : vector<16x128xf32> to vector<16x128xbf16>
    %c0_6 = arith.constant 0 : index
    %c0_7 = arith.constant 0 : index
    %9 = vector.load %arg4[%c0_6, %c0_7] : memref<16x128xbf16, #tpu.memory_space<vmem>>, vector<16x128xbf16>
    tpu.vector_store %arg4[%c0_6, %c0_7], %8 {strides = array<i32>} : memref<16x128xbf16, #tpu.memory_space<vmem>>, vector<16x128xbf16>,
    return
  }
  func.func @transform_0(%arg0: i32) -> (i32, i32) {
    %c0_i32 = arith.constant 0 : i32
    %c0_i32_0 = arith.constant 0 : i32
    return %arg0, %c0_i32 : i32, i32
  }
  func.func @transform_1(%arg0: i32) -> (i32, i32) {
    %c0_i32 = arith.constant 0 : i32
    %c0_i32_0 = arith.constant 0 : i32
    %c0_i32_1 = arith.constant 0 : i32
    return %c0_i32, %c0_i32_0 : i32, i32
  }
  func.func @transform_2(%arg0: i32) -> (i32, i32) {
    %c0_i32 = arith.constant 0 : i32
    %c0_i32_0 = arith.constant 0 : i32
    %c0_i32_1 = arith.constant 0 : i32
    return %c0_i32, %c0_i32_0 : i32, i32
  }
  func.func @transform_3(%arg0: i32) -> (i32, i32) {
    %c0_i32 = arith.constant 0 : i32
    %c0_i32_0 = arith.constant 0 : i32
    return %arg0, %c0_i32 : i32, i32
  }
}

module attributes {stable_mosaic.version = 11 : i64} {
  func.func @_matmul_bias_relu_kernel(%arg0: i32, %arg1: memref<8x1152xbf16, #tpu.memory_space<vmem>>, %arg2: memref<1152x128xbf16, #tpu.memory_space<vmem>>, %arg3: memref<1x128xf32, #tpu.memory_space<vmem>>, %arg4: memref<8x128xbf16, #tpu.memory_space<vmem>>) attributes {dimension_semantics = [#tpu.dimension_semantics<parallel>], iteration_bounds = array<i64: 1>, scalar_prefetch = 0 : i64, scratch_operands = 0 : i64, tpu.core_type = #tpu.core_type<tc>, window_params = [{transform_indices = @transform_0, window_bounds = array<i64: 8, 1152>}, {pipeline_mode = #tpu.pipeline_mode<synchronous>, transform_indices = @transform_1, window_bounds = array<i64: 1152, 128>}, {pipeline_mode = #tpu.pipeline_mode<synchronous>, transform_indices = @transform_2, window_bounds = array<i64: 1, 128>}, {transform_indices = @transform_3, window_bounds = array<i64: 8, 128>}]} {
    %c0 = arith.constant 0 : index
    %c0_0 = arith.constant 0 : index
    %0 = vector.load %arg1[%c0, %c0_0] : memref<8x1152xbf16, #tpu.memory_space<vmem>>, vector<8x1152xbf16>
    %c0_1 = arith.constant 0 : index
    %c0_2 = arith.constant 0 : index
    %1 = vector.load %arg2[%c0_1, %c0_2] : memref<1152x128xbf16, #tpu.memory_space<vmem>>, vector<1152x128xbf16>
    %cst = arith.constant dense<0.000000e+00> : vector<8x128xf32>
    %2 = tpu.matmul %0, %1, %cst {dimension_numbers = #tpu.dot_dimension_numbers<[1], [0], [0], [1], [0, 0, 1, 1], [], []>} : vector<8x1152xbf16>, vector<1152x128xbf16>, vector<8x128xf32> -> vector<8x128xf32>
    %c0_3 = arith.constant 0 : index
    %c0_4 = arith.constant 0 : index
    %3 = vector.load %arg3[%c0_3, %c0_4] : memref<1x128xf32, #tpu.memory_space<vmem>>, vector<1x128xf32>
    %4 = vector.broadcast %3 : vector<1x128xf32> to vector<8x128xf32>
    %5 = arith.addf %2, %4 : vector<8x128xf32>
    %cst_5 = arith.constant 0.000000e+00 : f32
    %6 = vector.broadcast %cst_5 : f32 to vector<8x128xf32>
    %7 = arith.maximumf %5, %6 : vector<8x128xf32>
    %8 = arith.truncf %7 : vector<8x128xf32> to vector<8x128xbf16>
    %c0_6 = arith.constant 0 : index
    %c0_7 = arith.constant 0 : index
    %9 = vector.load %arg4[%c0_6, %c0_7] : memref<8x128xbf16, #tpu.memory_space<vmem>>, vector<8x128xbf16>
    tpu.vector_store %arg4[%c0_6, %c0_7], %8 {strides = array<i32>} : memref<8x128xbf16, #tpu.memory_space<vmem>>, vector<8x128xbf16>,
    return
  }
  func.func @transform_0(%arg0: i32) -> (i32, i32) {
    %c0_i32 = arith.constant 0 : i32
    %c0_i32_0 = arith.constant 0 : i32
    return %arg0, %c0_i32 : i32, i32
  }
  func.func @transform_1(%arg0: i32) -> (i32, i32) {
    %c0_i32 = arith.constant 0 : i32
    %c0_i32_0 = arith.constant 0 : i32
    %c0_i32_1 = arith.constant 0 : i32
    return %c0_i32, %c0_i32_0 : i32, i32
  }
  func.func @transform_2(%arg0: i32) -> (i32, i32) {
    %c0_i32 = arith.constant 0 : i32
    %c0_i32_0 = arith.constant 0 : i32
    %c0_i32_1 = arith.constant 0 : i32
    return %c0_i32, %c0_i32_0 : i32, i32
  }
  func.func @transform_3(%arg0: i32) -> (i32, i32) {
    %c0_i32 = arith.constant 0 : i32
    %c0_i32_0 = arith.constant 0 : i32
    return %arg0, %c0_i32 : i32, i32
  }
}

module attributes {stable_mosaic.version = 11 : i64} {
  func.func @_head_kernel(%arg0: memref<8x128xbf16, #tpu.memory_space<vmem>>, %arg1: memref<8x128xbf16, #tpu.memory_space<vmem>>, %arg2: memref<128x256xbf16, #tpu.memory_space<vmem>>, %arg3: memref<1x256xf32, #tpu.memory_space<vmem>>, %arg4: memref<128x256xbf16, #tpu.memory_space<vmem>>, %arg5: memref<1x256xf32, #tpu.memory_space<vmem>>, %arg6: memref<256x128xbf16, #tpu.memory_space<vmem>>, %arg7: memref<1x128xf32, #tpu.memory_space<vmem>>, %arg8: memref<128x128xbf16, #tpu.memory_space<vmem>>, %arg9: memref<1x128xf32, #tpu.memory_space<vmem>>, %arg10: memref<128x128xbf16, #tpu.memory_space<vmem>>, %arg11: memref<1x128xf32, #tpu.memory_space<vmem>>, %arg12: memref<128x128xbf16, #tpu.memory_space<vmem>>, %arg13: memref<1x128xf32, #tpu.memory_space<vmem>>, %arg14: memref<8x128xf32, #tpu.memory_space<vmem>>) attributes {dimension_semantics = [], scalar_prefetch = 0 : i64, scratch_operands = 0 : i64, tpu.core_type = #tpu.core_type<tc>} {
    %c0 = arith.constant 0 : index
    %c0_0 = arith.constant 0 : index
    %0 = vector.load %arg0[%c0, %c0_0] : memref<8x128xbf16, #tpu.memory_space<vmem>>, vector<8x128xbf16>
    %c0_1 = arith.constant 0 : index
    %c0_2 = arith.constant 0 : index
    %1 = vector.load %arg2[%c0_1, %c0_2] : memref<128x256xbf16, #tpu.memory_space<vmem>>, vector<128x256xbf16>
    %cst = arith.constant dense<0.000000e+00> : vector<8x256xf32>
    %2 = tpu.matmul %0, %1, %cst {dimension_numbers = #tpu.dot_dimension_numbers<[1], [0], [0], [1], [0, 0, 1, 1], [], []>} : vector<8x128xbf16>, vector<128x256xbf16>, vector<8x256xf32> -> vector<8x256xf32>
    %c0_3 = arith.constant 0 : index
    %c0_4 = arith.constant 0 : index
    %3 = vector.load %arg3[%c0_3, %c0_4] : memref<1x256xf32, #tpu.memory_space<vmem>>, vector<1x256xf32>
    %4 = vector.broadcast %3 : vector<1x256xf32> to vector<8x256xf32>
    %5 = arith.addf %2, %4 : vector<8x256xf32>
    %cst_5 = arith.constant 0.000000e+00 : f32
    %6 = vector.broadcast %cst_5 : f32 to vector<8x256xf32>
    %7 = arith.maximumf %5, %6 : vector<8x256xf32>
    %c0_6 = arith.constant 0 : index
    %c0_7 = arith.constant 0 : index
    %8 = vector.load %arg1[%c0_6, %c0_7] : memref<8x128xbf16, #tpu.memory_space<vmem>>, vector<8x128xbf16>
    %c0_8 = arith.constant 0 : index
    %c0_9 = arith.constant 0 : index
    %9 = vector.load %arg4[%c0_8, %c0_9] : memref<128x256xbf16, #tpu.memory_space<vmem>>, vector<128x256xbf16>
    %cst_10 = arith.constant dense<0.000000e+00> : vector<8x256xf32>
    %10 = tpu.matmul %8, %9, %cst_10 {dimension_numbers = #tpu.dot_dimension_numbers<[1], [0], [0], [1], [0, 0, 1, 1], [], []>} : vector<8x128xbf16>, vector<128x256xbf16>, vector<8x256xf32> -> vector<8x256xf32>
    %c0_11 = arith.constant 0 : index
    %c0_12 = arith.constant 0 : index
    %11 = vector.load %arg5[%c0_11, %c0_12] : memref<1x256xf32, #tpu.memory_space<vmem>>, vector<1x256xf32>
    %12 = vector.broadcast %11 : vector<1x256xf32> to vector<8x256xf32>
    %13 = arith.addf %10, %12 : vector<8x256xf32>
    %cst_13 = arith.constant 0.000000e+00 : f32
    %14 = vector.broadcast %cst_13 : f32 to vector<8x256xf32>
    %15 = arith.subf %14, %13 : vector<8x256xf32>
    %16 = math.exp %15 : vector<8x256xf32>
    %cst_14 = arith.constant 1.000000e+00 : f32
    %17 = vector.broadcast %cst_14 : f32 to vector<8x256xf32>
    %18 = arith.addf %17, %16 : vector<8x256xf32>
    %cst_15 = arith.constant 1.000000e+00 : f32
    %19 = vector.broadcast %cst_15 : f32 to vector<8x256xf32>
    %20 = arith.divf %19, %18 : vector<8x256xf32>
    %21 = arith.mulf %7, %20 : vector<8x256xf32>
    %22 = arith.truncf %21 : vector<8x256xf32> to vector<8x256xbf16>
    %c0_16 = arith.constant 0 : index
    %c0_17 = arith.constant 0 : index
    %23 = vector.load %arg6[%c0_16, %c0_17] : memref<256x128xbf16, #tpu.memory_space<vmem>>, vector<256x128xbf16>
    %cst_18 = arith.constant dense<0.000000e+00> : vector<8x128xf32>
    %24 = tpu.matmul %22, %23, %cst_18 {dimension_numbers = #tpu.dot_dimension_numbers<[1], [0], [0], [1], [0, 0, 1, 1], [], []>} : vector<8x256xbf16>, vector<256x128xbf16>, vector<8x128xf32> -> vector<8x128xf32>
    %c0_19 = arith.constant 0 : index
    %c0_20 = arith.constant 0 : index
    %25 = vector.load %arg7[%c0_19, %c0_20] : memref<1x128xf32, #tpu.memory_space<vmem>>, vector<1x128xf32>
    %26 = vector.broadcast %25 : vector<1x128xf32> to vector<8x128xf32>
    %27 = arith.addf %24, %26 : vector<8x128xf32>
    %cst_21 = arith.constant 0.000000e+00 : f32
    %28 = vector.broadcast %cst_21 : f32 to vector<8x128xf32>
    %29 = arith.maximumf %27, %28 : vector<8x128xf32>
    %30 = arith.truncf %29 : vector<8x128xf32> to vector<8x128xbf16>
    %c0_22 = arith.constant 0 : index
    %c0_23 = arith.constant 0 : index
    %31 = vector.load %arg8[%c0_22, %c0_23] : memref<128x128xbf16, #tpu.memory_space<vmem>>, vector<128x128xbf16>
    %cst_24 = arith.constant dense<0.000000e+00> : vector<8x128xf32>
    %32 = tpu.matmul %30, %31, %cst_24 {dimension_numbers = #tpu.dot_dimension_numbers<[1], [0], [0], [1], [0, 0, 1, 1], [], []>} : vector<8x128xbf16>, vector<128x128xbf16>, vector<8x128xf32> -> vector<8x128xf32>
    %c0_25 = arith.constant 0 : index
    %c0_26 = arith.constant 0 : index
    %33 = vector.load %arg9[%c0_25, %c0_26] : memref<1x128xf32, #tpu.memory_space<vmem>>, vector<1x128xf32>
    %34 = vector.broadcast %33 : vector<1x128xf32> to vector<8x128xf32>
    %35 = arith.addf %32, %34 : vector<8x128xf32>
    %cst_27 = arith.constant 0.000000e+00 : f32
    %36 = vector.broadcast %cst_27 : f32 to vector<8x128xf32>
    %37 = arith.maximumf %35, %36 : vector<8x128xf32>
    %38 = arith.truncf %37 : vector<8x128xf32> to vector<8x128xbf16>
    %c0_28 = arith.constant 0 : index
    %c0_29 = arith.constant 0 : index
    %39 = vector.load %arg10[%c0_28, %c0_29] : memref<128x128xbf16, #tpu.memory_space<vmem>>, vector<128x128xbf16>
    %cst_30 = arith.constant dense<0.000000e+00> : vector<8x128xf32>
    %40 = tpu.matmul %38, %39, %cst_30 {dimension_numbers = #tpu.dot_dimension_numbers<[1], [0], [0], [1], [0, 0, 1, 1], [], []>} : vector<8x128xbf16>, vector<128x128xbf16>, vector<8x128xf32> -> vector<8x128xf32>
    %c0_31 = arith.constant 0 : index
    %c0_32 = arith.constant 0 : index
    %41 = vector.load %arg11[%c0_31, %c0_32] : memref<1x128xf32, #tpu.memory_space<vmem>>, vector<1x128xf32>
    %42 = vector.broadcast %41 : vector<1x128xf32> to vector<8x128xf32>
    %43 = arith.addf %40, %42 : vector<8x128xf32>
    %cst_33 = arith.constant 0.000000e+00 : f32
    %44 = vector.broadcast %cst_33 : f32 to vector<8x128xf32>
    %45 = arith.maximumf %43, %44 : vector<8x128xf32>
    %46 = arith.truncf %45 : vector<8x128xf32> to vector<8x128xbf16>
    %c0_34 = arith.constant 0 : index
    %c0_35 = arith.constant 0 : index
    %47 = vector.load %arg12[%c0_34, %c0_35] : memref<128x128xbf16, #tpu.memory_space<vmem>>, vector<128x128xbf16>
    %cst_36 = arith.constant dense<0.000000e+00> : vector<8x128xf32>
    %48 = tpu.matmul %46, %47, %cst_36 {dimension_numbers = #tpu.dot_dimension_numbers<[1], [0], [0], [1], [0, 0, 1, 1], [], []>} : vector<8x128xbf16>, vector<128x128xbf16>, vector<8x128xf32> -> vector<8x128xf32>
    %c0_37 = arith.constant 0 : index
    %c0_38 = arith.constant 0 : index
    %49 = vector.load %arg13[%c0_37, %c0_38] : memref<1x128xf32, #tpu.memory_space<vmem>>, vector<1x128xf32>
    %50 = vector.broadcast %49 : vector<1x128xf32> to vector<8x128xf32>
    %51 = arith.addf %48, %50 : vector<8x128xf32>
    %52 = math.tanh %51 : vector<8x128xf32>
    %c0_39 = arith.constant 0 : index
    %c0_40 = arith.constant 0 : index
    %53 = vector.load %arg14[%c0_39, %c0_40] : memref<8x128xf32, #tpu.memory_space<vmem>>, vector<8x128xf32>
    tpu.vector_store %arg14[%c0_39, %c0_40], %52 {strides = array<i32>} : memref<8x128xf32, #tpu.memory_space<vmem>>, vector<8x128xf32>,
    return
  }
}

</mosaic_0001>

<bundles_post_ra>
// kernel: tinycar_combo_forward.6
= control target key start
LH: loop header
LB: loop body
LE: loop exit
PB: predicated region body
PF: predicated region fallthrough
CT: control target
= control target key end

     0   :  { %s1126_s12 = smov 0   ;;  %s1247_s0 = inlined_call_operand.vmem [shape: bf16[512,128], index: 0, kind: input, shape index: {}]   ;;  %s1248_s1 = inlined_call_operand.vmem [shape: bf16[128,128], index: 1, kind: input, shape index: {}]   ;;  %s1249_s2 = inlined_call_operand.vmem [shape: f32[1,128], index: 2, kind: input, shape index: {}]   ;;  %s1250_s3 = inlined_call_operand.vmem [shape: bf16[512,128], index: 3, kind: output, shape index: {}]  }
   0x1 LB: > { %s783_s13 = sadd.s32 4294967295, %s1104_s12   ;;  %p787_p0 = scmp.ge.s32.totalorder %s1104_s12, 1  ;;  %s1104_s12 = sphi %s1126_s12, %s13_s12  }
   0x2   : > { %p138_p1 = scmp.lt.s32.totalorder %s1104_s12, 3 }
   0x4   : > { %p139_p2 = pnand %p787_p0, %p138_p1 }
   0x5   : > { %s788_s16 = sshll.u32 (!%p139_p2), %s783_s13, 5 }
   0x6   : > { %142 = sbr.rel (%p139_p2) target bundleno = 274 (0x112), region = 32  ;;  %p163_p3 = scmp.lt.s32.totalorder (!%p139_p2), %s788_s16, 63 }
   0xb   : > { %v1074_v0 = vld [vmem:[%s1248_s1 + $0x38] sm:$0xff]   ;;  %v1075_v1 = vld [vmem:[%s1248_s1 + $0x30] sm:$0xff]   ;;  %s1252_s16 = smov (!%p163_p3, %s788_s16), 63  ;;  %v1076_v2 = vld [vmem:[%s1248_s1 + $0x28] sm:$0xff]  }
   0xc   : > { %1002 = vmatprep.subr.bf16.mxu0 %v1074_v0  ;;  %1050 = vmatprep.subr.bf16.mxu1 %v1074_v0  ;;  %s789_s21 = sshll.u32 %s1252_s16, 2  ;;  %v1077_v3 = vld [vmem:[%s1248_s1 + $0x20] sm:$0xff]   ;;  %v1078_v6 = vld [vmem:[%s1248_s1 + $0x18] sm:$0xff]   ;;  %v1079_v7 = vld [vmem:[%s1248_s1 + $0x10] sm:$0xff]  }
   0xd   : > { %1003 = vmatpush3.bf16.msra.mxu0 %v1074_v0  ;;  %1058 = vmatpush3.bf16.msra.mxu1 %v1074_v0  ;;  %s1151_s24 = scalar_lea.vmem %s1247_s0, %s789_s21  ;;  %v1080_v8 = vld [vmem:[%s1248_s1 + $0x8] sm:$0xff]   ;;  %v1081_v9 = vld [vmem:[%s1248_s1] sm:$0xff]   ;;  %s1202_s13 = scalar_lea.vmem %s1250_s3, %s789_s21 }
   0xe   : > { %1004 = vmatprep.subr.bf16.mxu0 %v1075_v1  ;;  %1051 = vmatprep.subr.bf16.mxu1 %v1075_v1  ;;  %v1082_v4 = vld [vmem:[%s1151_s24] sm:$0xff]   ;;  %v1084_v10 = vld [vmem:[%s1151_s24 + $0x8] sm:$0xff]   ;;  %v1086_v12 = vld [vmem:[%s1151_s24 + $0x10] sm:$0xff]  }
   0xf   : > { %v1083_v5 = vld [vmem:[%s1151_s24 + $0x40] sm:$0xff]   ;;  %1018 = vmatprep.mubr.bf16.mxu0 %v1082_v4  ;;  %v1085_v11 = vld [vmem:[%s1151_s24 + $0x48] sm:$0xff]   ;;  %v1087_v13 = vld [vmem:[%s1151_s24 + $0x50] sm:$0xff]  }
  0x10   : > { %1034 = vmatprep.mubr.bf16.mxu1 %v1083_v5  ;;  %v1088_v14 = vld [vmem:[%s1151_s24 + $0x18] sm:$0xff]   ;;  %v1090_v16 = vld [vmem:[%s1151_s24 + $0x20] sm:$0xff]   ;;  %v1092_v18 = vld [vmem:[%s1151_s24 + $0x28] sm:$0xff]  }
  0x11   : > { %1005 = vmatpush3.bf16.msra.mxu0 %v1075_v1  ;;  %1059 = vmatpush3.bf16.msra.mxu1 %v1075_v1  ;;  %v1089_v15 = vld [vmem:[%s1151_s24 + $0x58] sm:$0xff]   ;;  %v1091_v17 = vld [vmem:[%s1151_s24 + $0x60] sm:$0xff]   ;;  %v1093_v19 = vld [vmem:[%s1151_s24 + $0x68] sm:$0xff]  }
  0x12   : > { %1006 = vmatprep.subr.bf16.mxu0 %v1076_v2  ;;  %1052 = vmatprep.subr.bf16.mxu1 %v1076_v2  ;;  %v1094_v20 = vld [vmem:[%s1151_s24 + $0x30] sm:$0xff]   ;;  %v1096_v22 = vld [vmem:[%s1151_s24 + $0x38] sm:$0xff]   ;;  %v1187_v24 = vld [vmem:[%s1249_s2] ss:$0 sm:$0xff] }
  0x13   : > { %v1095_v21 = vld [vmem:[%s1151_s24 + $0x70] sm:$0xff]   ;;  %v1097_v23 = vld [vmem:[%s1151_s24 + $0x78] sm:$0xff]  }
  0x15   : > { %1007 = vmatpush3.bf16.msra.mxu0 %v1076_v2  ;;  %1060 = vmatpush3.bf16.msra.mxu1 %v1076_v2 }
  0x16   : > { %1008 = vmatprep.subr.bf16.mxu0 %v1077_v3  ;;  %1053 = vmatprep.subr.bf16.mxu1 %v1077_v3 }
  0x19   : > { %1009 = vmatpush3.bf16.msra.mxu0 %v1077_v3  ;;  %1061 = vmatpush3.bf16.msra.mxu1 %v1077_v3 }
  0x1a   : > { %1010 = vmatprep.subr.bf16.mxu0 %v1078_v6  ;;  %1054 = vmatprep.subr.bf16.mxu1 %v1078_v6 }
  0x1d   : > { %1011 = vmatpush3.bf16.msra.mxu0 %v1078_v6  ;;  %1062 = vmatpush3.bf16.msra.mxu1 %v1078_v6 }
  0x1e   : > { %1012 = vmatprep.subr.bf16.mxu0 %v1079_v7  ;;  %1055 = vmatprep.subr.bf16.mxu1 %v1079_v7 }
  0x21   : > { %1013 = vmatpush3.bf16.msra.mxu0 %v1079_v7  ;;  %1063 = vmatpush3.bf16.msra.mxu1 %v1079_v7 }
  0x22   : > { %1014 = vmatprep.subr.bf16.mxu0 %v1080_v8  ;;  %1056 = vmatprep.subr.bf16.mxu1 %v1080_v8 }
  0x25   : > { %1015 = vmatpush3.bf16.msra.mxu0 %v1080_v8  ;;  %1064 = vmatpush3.bf16.msra.mxu1 %v1080_v8 }
  0x26   : > { %1016 = vmatprep.subr.bf16.mxu0 %v1081_v9  ;;  %1057 = vmatprep.subr.bf16.mxu1 %v1081_v9 }
  0x29   : > { %1017 = vmatpush3.bf16.msra.mxu0 %v1081_v9  ;;  %1065 = vmatpush3.bf16.msra.mxu1 %v1081_v9 }
  0x2c   : > { %1019 = vmatmul.mubr.bf16.vlgmr.msra.gmra.mxu0 %v1084_v10  ;;  %1035 = vmatmul.mubr.bf16.vlgmr.msra.gmra.mxu1 %v1085_v11 }
  0x2d   : > { %1022 = vmatprep.mubr.bf16.mxu0 %v1086_v12  ;;  %1038 = vmatprep.mubr.bf16.mxu1 %v1087_v13 }
  0x34   : > { %1023 = vmatmul.mubr.bf16.gmra.mxu0 %v1088_v14  ;;  %1039 = vmatmul.mubr.bf16.gmra.mxu1 %v1089_v15 }
  0x35   : > { %1026 = vmatprep.mubr.bf16.mxu0 %v1090_v16  ;;  %1042 = vmatprep.mubr.bf16.mxu1 %v1091_v17 }
  0x3c   : > { %1027 = vmatmul.mubr.bf16.gmra.mxu0 %v1092_v18  ;;  %1043 = vmatmul.mubr.bf16.gmra.mxu1 %v1093_v19 }
  0x3d   : > { %1030 = vmatprep.mubr.bf16.mxu0 %v1094_v20  ;;  %1046 = vmatprep.mubr.bf16.mxu1 %v1095_v21 }
  0x44   : > { %1031 = vmatmul.mubr.bf16.gmra.mxu0 %v1096_v22  ;;  %1047 = vmatmul.mubr.bf16.gmra.mxu1 %v1097_v23 }
  0xec   : > { %v1020_v25 = vpop.f32.mrf.mxu0  ;;  %v1036_v26 = vpop.f32.mrf.mxu1 }
  0xed   : > { %v417_v27 = vadd.f32 %v1020_v25, %v1187_v24  ;;  %v481_v28 = vadd.f32 %v1036_v26, %v1187_v24 }
  0xee   : > { %v408_v29 = vpop.f32.mrf.mxu0  ;;  %v472_v30 = vpop.f32.mrf.mxu1 }
  0xef   : > { %v409_v31 = vadd.f32 %v1187_v24, %v408_v29  ;;  %v473_v32 = vadd.f32 %v1187_v24, %v472_v30  ;;  %v537_v37 = vmax.f32 %v417_v27, 0.0  ;;  %v553_v38 = vmax.f32 %v481_v28, 0.0 }
  0xf0   : > { %v1021_v33 = vpop.f32.mrf.mxu0  ;;  %v1037_v34 = vpop.f32.mrf.mxu1 }
  0xf1   : > { %v420_v35 = vadd.f32 %v1021_v33, %v1187_v24  ;;  %v484_v36 = vadd.f32 %v1037_v34, %v1187_v24  ;;  %v535_v45 = vmax.f32 %v409_v31, 0.0  ;;  %v551_v46 = vmax.f32 %v473_v32, 0.0 }
  0xf2   : > { %v411_v39 = vpop.f32.mrf.mxu0  ;;  %v475_v40 = vpop.f32.mrf.mxu1 }
  0xf3   : > { %v538_v41 = vmax.f32 %v420_v35, 0.0  ;;  %v554_v42 = vmax.f32 %v484_v36, 0.0  ;;  %v412_v43 = vadd.f32 %v1187_v24, %v411_v39  ;;  %v476_v44 = vadd.f32 %v1187_v24, %v475_v40 }
  0xf4   : > { %v1024_v47 = vpop.f32.mrf.mxu0  ;;  %v1040_v48 = vpop.f32.mrf.mxu1 }
  0xf5   : > { %v891_v49 = vpack.c.bf16 %v538_v41, %v537_v37  ;;  %v931_v50 = vpack.c.bf16 %v554_v42, %v553_v38  ;;  %v536_v51 = vmax.f32 %v412_v43, 0.0  ;;  %v552_v52 = vmax.f32 %v476_v44, 0.0 }
  0xf6   : > { %v433_v53 = vadd.f32 %v1024_v47, %v1187_v24  ;;  %v497_v54 = vadd.f32 %v1040_v48, %v1187_v24  ;;  %v424_v55 = vpop.f32.mrf.mxu0  ;;  %v488_v56 = vpop.f32.mrf.mxu1 }
  0xf7   : > { %963 = vst [vmem:[%s1202_s13 + $0x8] sm:$0xff] %v891_v49   ;;  %971 = vst [vmem:[%s1202_s13 + $0x48] sm:$0xff] %v931_v50   ;;  %v886_v57 = vpack.c.bf16 %v536_v51, %v535_v45  ;;  %v926_v58 = vpack.c.bf16 %v552_v52, %v551_v46  ;;  %v425_v59 = vadd.f32 %v1187_v24, %v424_v55 }
  0xf8   : > { %v489_v60 = vadd.f32 %v1187_v24, %v488_v56  ;;  %v1025_v61 = vpop.f32.mrf.mxu0  ;;  %v1041_v62 = vpop.f32.mrf.mxu1  ;;  %v541_v1 = vmax.f32 %v433_v53, 0.0  ;;  %v557_v2 = vmax.f32 %v497_v54, 0.0 }
  0xf9   : > { %887 = vst [vmem:[%s1202_s13] sm:$0xff] %v886_v57   ;;  %970 = vst [vmem:[%s1202_s13 + $0x40] sm:$0xff] %v926_v58   ;;  %v436_v63 = vadd.f32 %v1025_v61, %v1187_v24  ;;  %v500_v0 = vadd.f32 %v1041_v62, %v1187_v24  ;;  %v539_v9 = vmax.f32 %v425_v59, 0.0 }
  0xfa   : > { %v427_v3 = vpop.f32.mrf.mxu0  ;;  %v491_v4 = vpop.f32.mrf.mxu1  ;;  %v555_v10 = vmax.f32 %v489_v60, 0.0 }
  0xfb   : > { %v542_v5 = vmax.f32 %v436_v63, 0.0  ;;  %v558_v6 = vmax.f32 %v500_v0, 0.0  ;;  %v428_v7 = vadd.f32 %v1187_v24, %v427_v3  ;;  %v492_v8 = vadd.f32 %v1187_v24, %v491_v4 }
  0xfc   : > { %v1028_v11 = vpop.f32.mrf.mxu0  ;;  %v1044_v12 = vpop.f32.mrf.mxu1 }
  0xfd   : > { %v901_v13 = vpack.c.bf16 %v542_v5, %v541_v1  ;;  %v941_v14 = vpack.c.bf16 %v558_v6, %v557_v2  ;;  %v540_v15 = vmax.f32 %v428_v7, 0.0  ;;  %v556_v16 = vmax.f32 %v492_v8, 0.0 }
  0xfe   : > { %v449_v17 = vadd.f32 %v1028_v11, %v1187_v24  ;;  %v513_v18 = vadd.f32 %v1044_v12, %v1187_v24  ;;  %v440_v19 = vpop.f32.mrf.mxu0  ;;  %v504_v20 = vpop.f32.mrf.mxu1 }
  0xff   : > { %965 = vst [vmem:[%s1202_s13 + $0x18] sm:$0xff] %v901_v13   ;;  %973 = vst [vmem:[%s1202_s13 + $0x58] sm:$0xff] %v941_v14   ;;  %v896_v21 = vpack.c.bf16 %v540_v15, %v539_v9  ;;  %v936_v22 = vpack.c.bf16 %v556_v16, %v555_v10  ;;  %v441_v23 = vadd.f32 %v1187_v24, %v440_v19 }
 0x100   : > { %v505_v25 = vadd.f32 %v1187_v24, %v504_v20  ;;  %v1029_v26 = vpop.f32.mrf.mxu0  ;;  %v1045_v27 = vpop.f32.mrf.mxu1  ;;  %v545_v30 = vmax.f32 %v449_v17, 0.0  ;;  %v561_v31 = vmax.f32 %v513_v18, 0.0 }
 0x101   : > { %964 = vst [vmem:[%s1202_s13 + $0x10] sm:$0xff] %v896_v21   ;;  %972 = vst [vmem:[%s1202_s13 + $0x50] sm:$0xff] %v936_v22   ;;  %v452_v28 = vadd.f32 %v1029_v26, %v1187_v24  ;;  %v516_v29 = vadd.f32 %v1045_v27, %v1187_v24  ;;  %v543_v38 = vmax.f32 %v441_v23, 0.0 }
 0x102   : > { %v443_v32 = vpop.f32.mrf.mxu0  ;;  %v507_v33 = vpop.f32.mrf.mxu1  ;;  %v559_v39 = vmax.f32 %v505_v25, 0.0 }
 0x103   : > { %v546_v34 = vmax.f32 %v452_v28, 0.0  ;;  %v562_v35 = vmax.f32 %v516_v29, 0.0  ;;  %v444_v36 = vadd.f32 %v1187_v24, %v443_v32  ;;  %v508_v37 = vadd.f32 %v1187_v24, %v507_v33 }
 0x104   : > { %v1032_v40 = vpop.f32.mrf.mxu0  ;;  %v1048_v41 = vpop.f32.mrf.mxu1 }
 0x105   : > { %v911_v42 = vpack.c.bf16 %v546_v34, %v545_v30  ;;  %v951_v43 = vpack.c.bf16 %v562_v35, %v561_v31  ;;  %v544_v44 = vmax.f32 %v444_v36, 0.0  ;;  %v560_v45 = vmax.f32 %v508_v37, 0.0 }
 0x106   : > { %v465_v46 = vadd.f32 %v1032_v40, %v1187_v24  ;;  %v529_v47 = vadd.f32 %v1048_v41, %v1187_v24  ;;  %v456_v48 = vpop.f32.mrf.mxu0  ;;  %v520_v49 = vpop.f32.mrf.mxu1 }
 0x107   : > { %967 = vst [vmem:[%s1202_s13 + $0x28] sm:$0xff] %v911_v42   ;;  %975 = vst [vmem:[%s1202_s13 + $0x68] sm:$0xff] %v951_v43   ;;  %v906_v50 = vpack.c.bf16 %v544_v44, %v543_v38  ;;  %v946_v51 = vpack.c.bf16 %v560_v45, %v559_v39  ;;  %v457_v52 = vadd.f32 %v1187_v24, %v456_v48 }
 0x108   : > { %v521_v53 = vadd.f32 %v1187_v24, %v520_v49  ;;  %v1033_v54 = vpop.f32.mrf.mxu0  ;;  %v1049_v55 = vpop.f32.mrf.mxu1  ;;  %v549_v58 = vmax.f32 %v465_v46, 0.0  ;;  %v565_v59 = vmax.f32 %v529_v47, 0.0 }
 0x109   : > { %966 = vst [vmem:[%s1202_s13 + $0x20] sm:$0xff] %v906_v50   ;;  %974 = vst [vmem:[%s1202_s13 + $0x60] sm:$0xff] %v946_v51   ;;  %v468_v56 = vadd.f32 %v1033_v54, %v1187_v24  ;;  %v532_v57 = vadd.f32 %v1049_v55, %v1187_v24  ;;  %v547_v2 = vmax.f32 %v457_v52, 0.0 }
 0x10a   : > { %v459_v60 = vpop.f32.mrf.mxu0  ;;  %v523_v61 = vpop.f32.mrf.mxu1  ;;  %v563_v3 = vmax.f32 %v521_v53, 0.0 }
 0x10b   : > { %v550_v62 = vmax.f32 %v468_v56, 0.0  ;;  %v566_v63 = vmax.f32 %v532_v57, 0.0  ;;  %v460_v0 = vadd.f32 %v1187_v24, %v459_v60  ;;  %v524_v1 = vadd.f32 %v1187_v24, %v523_v61 }
 0x10d   : > { %v921_v4 = vpack.c.bf16 %v550_v62, %v549_v58  ;;  %v961_v5 = vpack.c.bf16 %v566_v63, %v565_v59  ;;  %v548_v6 = vmax.f32 %v460_v0, 0.0  ;;  %v564_v7 = vmax.f32 %v524_v1, 0.0 }
 0x10f   : > { %969 = vst [vmem:[%s1202_s13 + $0x38] sm:$0xff] %v921_v4   ;;  %977 = vst [vmem:[%s1202_s13 + $0x78] sm:$0xff] %v961_v5   ;;  %v916_v8 = vpack.c.bf16 %v548_v6, %v547_v2  ;;  %v956_v9 = vpack.c.bf16 %v564_v7, %v563_v3 }
 0x111   : > { %968 = vst [vmem:[%s1202_s13 + $0x30] sm:$0xff] %v916_v8   ;;  %976 = vst [vmem:[%s1202_s13 + $0x70] sm:$0xff] %v956_v9  }
 0x112 PF: > { %s13_s12 = sadd.s32 1, %s1104_s12  }
 0x113   : > { %p10_p4 = scmp.ge.s32.totalorder %s13_s12, 4  }
 0x115   :  { %12 = sbr.rel (!%p10_p4) target bundleno = 1 (0x1), region = 62 }

// kernel: tinycar_combo_forward.7
= control target key start
LH: loop header
LB: loop body
LE: loop exit
PB: predicated region body
PF: predicated region fallthrough
CT: control target
= control target key end

     0   :  { %s1946_s12 = smov 0   ;;  %s2289_s0 = inlined_call_operand.vmem [shape: bf16[128,1152], index: 0, kind: input, shape index: {}]   ;;  %s2290_s1 = inlined_call_operand.vmem [shape: bf16[1152,128], index: 1, kind: input, shape index: {}]   ;;  %s2291_s2 = inlined_call_operand.vmem [shape: f32[1,128], index: 2, kind: input, shape index: {}]   ;;  %s2292_s3 = inlined_call_operand.vmem [shape: bf16[128,128], index: 3, kind: output, shape index: {}]  }
   0x1 LB: > { %s1414_s13 = sadd.s32 4294967295, %s1924_s12   ;;  %p1418_p0 = scmp.ge.s32.totalorder %s1924_s12, 1  ;;  %s1924_s12 = sphi %s1946_s12, %s13_s12  }
   0x2   : > { %p139_p1 = scmp.lt.s32.totalorder %s1924_s12, 3 }
   0x4   : > { %p140_p2 = pnand %p1418_p0, %p139_p1 }
   0x6   : > { %143 = sbr.rel (%p140_p2) target bundleno = 317 (0x13d), region = 32 }
   0xb   : > { %v1794_v0 = vld [vmem:[%s2290_s1 + $0x78] sm:$0xff]   ;;  %v1798_v4 = vld [vmem:[%s2290_s1 + $0x70] sm:$0xff]   ;;  %v1802_v8 = vld [vmem:[%s2290_s1 + $0x68] sm:$0xff]   ;;  %s1419_s19 = sshll.u32 %s1414_s13, 3 }
   0xc   : > { %v1795_v1 = vld [vmem:[%s2290_s1 + $0xf8] sm:$0xff]   ;;  %1573 = vmatprep.subr.bf16.mxu0 %v1794_v0  ;;  %v1799_v5 = vld [vmem:[%s2290_s1 + $0xf0] sm:$0xff]   ;;  %v1803_v9 = vld [vmem:[%s2290_s1 + $0xe8] sm:$0xff]   ;;  %p165_p3 = scmp.lt.s32.totalorder %s1419_s19, 15 }
   0xd   : > { %v1796_v2 = vld [vmem:[%s2290_s1 + $0x38] sm:$0xff]   ;;  %1613 = vmatprep.subr.bf16.mxu1 %v1795_v1  ;;  %v1800_v6 = vld [vmem:[%s2290_s1 + $0x30] sm:$0xff]   ;;  %v1804_v10 = vld [vmem:[%s2290_s1 + $0x28] sm:$0xff]  }
   0xe   : > { %v1797_v3 = vld [vmem:[%s2290_s1 + $0xb8] sm:$0xff]   ;;  %1574 = vmatpush3.bf16.msra.mxu0 %v1796_v2  ;;  %v1801_v7 = vld [vmem:[%s2290_s1 + $0xb0] sm:$0xff]   ;;  %v1805_v11 = vld [vmem:[%s2290_s1 + $0xa8] sm:$0xff]   ;;  %s2304_s19 = smov (!%p165_p3, %s1419_s19), 15 }
   0xf   : > { %1614 = vmatpush3.bf16.msra.mxu1 %v1797_v3  ;;  %1575 = vmatprep.subr.bf16.mxu0 %v1798_v4  ;;  %v1806_v12 = vld [vmem:[%s2290_s1 + $0x60] sm:$0xff]   ;;  %v1810_v16 = vld [vmem:[%s2290_s1 + $0x58] sm:$0xff]   ;;  %v1814_v20 = vld [vmem:[%s2290_s1 + $0x50] sm:$0xff]   ;;  %s1785_s16 = smul.u32 36, %s2304_s19 }
  0x10   : > { %1615 = vmatprep.subr.bf16.mxu1 %v1799_v5  ;;  %v1807_v13 = vld [vmem:[%s2290_s1 + $0xe0] sm:$0xff]   ;;  %v1811_v17 = vld [vmem:[%s2290_s1 + $0xd8] sm:$0xff]   ;;  %v1815_v21 = vld [vmem:[%s2290_s1 + $0xd0] sm:$0xff]  }
  0x11   : > { %v1808_v14 = vld [vmem:[%s2290_s1 + $0x20] sm:$0xff]   ;;  %v1812_v18 = vld [vmem:[%s2290_s1 + $0x18] sm:$0xff]   ;;  %v1816_v22 = vld [vmem:[%s2290_s1 + $0x10] sm:$0xff]   ;;  %s2052_s13 = scalar_lea.vmem %s2289_s0, %s1785_s16  ;;  %s1422_s16 = sshll.u32 %s2304_s19, 2 }
  0x12   : > { %1576 = vmatpush3.bf16.msra.mxu0 %v1800_v6  ;;  %v1809_v15 = vld [vmem:[%s2290_s1 + $0xa0] sm:$0xff]   ;;  %v1813_v19 = vld [vmem:[%s2290_s1 + $0x98] sm:$0xff]   ;;  %v1817_v23 = vld [vmem:[%s2290_s1 + $0x90] sm:$0xff]   ;;  %s175_s20 = scalar_lea.vmem %s2292_s3, %s1422_s16 }
  0x13   : > { %1616 = vmatpush3.bf16.msra.mxu1 %v1801_v7  ;;  %1577 = vmatprep.subr.bf16.mxu0 %v1802_v8  ;;  %v1818_v24 = vld [vmem:[%s2290_s1 + $0x48] sm:$0xff]   ;;  %v1822_v28 = vld [vmem:[%s2290_s1 + $0x40] sm:$0xff]   ;;  %v1832_v36 = vld [vmem:[%s2290_s1 + $0x178] sm:$0xff]  }
  0x14   : > { %1617 = vmatprep.subr.bf16.mxu1 %v1803_v9  ;;  %v1819_v25 = vld [vmem:[%s2290_s1 + $0xc8] sm:$0xff]   ;;  %v1823_v29 = vld [vmem:[%s2290_s1 + $0xc0] sm:$0xff]   ;;  %v1833_v37 = vld [vmem:[%s2290_s1 + $0x1f8] sm:$0xff]  }
  0x15   : > { %v1820_v26 = vld [vmem:[%s2290_s1 + $0x8] sm:$0xff]   ;;  %v1824_v30 = vld [vmem:[%s2290_s1] sm:$0xff]   ;;  %v1834_v38 = vld [vmem:[%s2290_s1 + $0x138] sm:$0xff]  }
  0x16   : > { %1578 = vmatpush3.bf16.msra.mxu0 %v1804_v10  ;;  %v1821_v27 = vld [vmem:[%s2290_s1 + $0x88] sm:$0xff]   ;;  %v1825_v31 = vld [vmem:[%s2290_s1 + $0x80] sm:$0xff]   ;;  %v1835_v39 = vld [vmem:[%s2290_s1 + $0x1b8] sm:$0xff]  }
  0x17   : > { %1618 = vmatpush3.bf16.msra.mxu1 %v1805_v11  ;;  %1579 = vmatprep.subr.bf16.mxu0 %v1806_v12  ;;  %v1826_v32 = vld [vmem:[%s2052_s13] ss:$36 sps:$4 sm:$0xff]   ;;  %v1829_v34 = vld [vmem:[%s2052_s13 + $0x8] ss:$36 sps:$4 sm:$0xff]   ;;  %v1836_v40 = vld [vmem:[%s2290_s1 + $0x170] sm:$0xff]  }
  0x18   : > { %1619 = vmatprep.subr.bf16.mxu1 %v1807_v13  ;;  %v1828_v33 = vld [vmem:[%s2052_s13 + $0x4] ss:$36 sps:$4 sm:$0xff]   ;;  %v1831_v35 = vld [vmem:[%s2052_s13 + $0xc] ss:$36 sps:$4 sm:$0xff]   ;;  %v1842_v45 = vld [vmem:[%s2052_s13 + $0x54] ss:$36 sps:$4 sm:$0xff]  }
  0x19   : > { %1017 = vmatprep.mubr.bf16.mxu0 %v1828_v33  ;;  %1082 = vmatprep.mubr.bf16.mxu1 %v1831_v35  ;;  %v1837_v41 = vld [vmem:[%s2290_s1 + $0x1f0] sm:$0xff]   ;;  %v1844_v46 = vld [vmem:[%s2052_s13 + $0x48] ss:$36 sps:$4 sm:$0xff]   ;;  %v1850_v52 = vld [vmem:[%s2290_s1 + $0x160] sm:$0xff]  }
  0x1a   : > { %1580 = vmatpush3.bf16.msra.mxu0 %v1808_v14  ;;  %v1838_v42 = vld [vmem:[%s2290_s1 + $0x130] sm:$0xff]   ;;  %v1846_v48 = vld [vmem:[%s2290_s1 + $0x168] sm:$0xff]   ;;  %v1851_v53 = vld [vmem:[%s2290_s1 + $0x1e0] sm:$0xff]  }
  0x1b   : > { %1620 = vmatpush3.bf16.msra.mxu1 %v1809_v15  ;;  %1581 = vmatprep.subr.bf16.mxu0 %v1810_v16  ;;  %v1839_v43 = vld [vmem:[%s2290_s1 + $0x1b0] sm:$0xff]   ;;  %v1847_v49 = vld [vmem:[%s2290_s1 + $0x1e8] sm:$0xff]   ;;  %v1852_v54 = vld [vmem:[%s2290_s1 + $0x120] sm:$0xff]  }
  0x1c   : > { %1621 = vmatprep.subr.bf16.mxu1 %v1811_v17  ;;  %v1840_v44 = vld [vmem:[%s2052_s13 + $0x4c] ss:$36 sps:$4 sm:$0xff]   ;;  %v1853_v55 = vld [vmem:[%s2290_s1 + $0x1a0] sm:$0xff]   ;;  %v1854_v56 = vld [vmem:[%s2052_s13 + $0x94] ss:$36 sps:$4 sm:$0xff]  }
  0x1d   : > { %v1845_v47 = vld [vmem:[%s2052_s13 + $0x50] ss:$36 sps:$4 sm:$0xff]   ;;  %v1848_v50 = vld [vmem:[%s2290_s1 + $0x128] sm:$0xff]   ;;  %v1856_v57 = vld [vmem:[%s2052_s13 + $0x9c] ss:$36 sps:$4 sm:$0xff]  }
  0x1e   : > { %1582 = vmatpush3.bf16.msra.mxu0 %v1812_v18  ;;  %v1849_v51 = vld [vmem:[%s2290_s1 + $0x1a8] sm:$0xff]   ;;  %v1858_v58 = vld [vmem:[%s2052_s13 + $0x90] ss:$36 sps:$4 sm:$0xff]   ;;  %v1859_v59 = vld [vmem:[%s2052_s13 + $0x98] ss:$36 sps:$4 sm:$0xff]  }
  0x1f   : > { %1622 = vmatpush3.bf16.msra.mxu1 %v1813_v19  ;;  %1583 = vmatprep.subr.bf16.mxu0 %v1814_v20  ;;  %v1860_v60 = vld [vmem:[%s2290_s1 + $0x158] sm:$0xff]   ;;  %v1864_v0 = vld [vmem:[%s2290_s1 + $0x150] sm:$0xff]   ;;  %v1870_v5 = vld [vmem:[%s2052_s13 + $0xe4] ss:$36 sps:$4 sm:$0xff]  }
  0x20   : > { %1623 = vmatprep.subr.bf16.mxu1 %v1815_v21  ;;  %v1861_v61 = vld [vmem:[%s2290_s1 + $0x1d8] sm:$0xff]   ;;  %v1865_v1 = vld [vmem:[%s2290_s1 + $0x1d0] sm:$0xff]   ;;  %v1873_v7 = vld [vmem:[%s2052_s13 + $0xe0] ss:$36 sps:$4 sm:$0xff]  }
  0x21   : > { %v1862_v62 = vld [vmem:[%s2290_s1 + $0x118] sm:$0xff]   ;;  %v1866_v2 = vld [vmem:[%s2290_s1 + $0x110] sm:$0xff]   ;;  %v1874_v8 = vld [vmem:[%s2290_s1 + $0x148] sm:$0xff]  }
  0x22   : > { %1584 = vmatpush3.bf16.msra.mxu0 %v1816_v22  ;;  %v1863_v63 = vld [vmem:[%s2290_s1 + $0x198] sm:$0xff]   ;;  %v1867_v3 = vld [vmem:[%s2290_s1 + $0x190] sm:$0xff]   ;;  %v1875_v9 = vld [vmem:[%s2290_s1 + $0x1c8] sm:$0xff]  }
  0x23   : > { %1624 = vmatpush3.bf16.msra.mxu1 %v1817_v23  ;;  %1585 = vmatprep.subr.bf16.mxu0 %v1818_v24  ;;  %v1868_v4 = vld [vmem:[%s2052_s13 + $0xdc] ss:$36 sps:$4 sm:$0xff]   ;;  %v1876_v10 = vld [vmem:[%s2290_s1 + $0x108] sm:$0xff]   ;;  %v1882_v16 = vld [vmem:[%s2052_s13 + $0x10] ss:$36 sps:$4 sm:$0xff]  }
  0x24   : > { %1625 = vmatprep.subr.bf16.mxu1 %v1819_v25  ;;  %v1872_v6 = vld [vmem:[%s2052_s13 + $0xd8] ss:$36 sps:$4 sm:$0xff]   ;;  %v1877_v11 = vld [vmem:[%s2290_s1 + $0x188] sm:$0xff]   ;;  %v1878_v12 = vld [vmem:[%s2290_s1 + $0x140] sm:$0xff]  }
  0x25   : > { %v1879_v13 = vld [vmem:[%s2290_s1 + $0x1c0] sm:$0xff]   ;;  %v1884_v17 = vld [vmem:[%s2052_s13 + $0x14] ss:$36 sps:$4 sm:$0xff]   ;;  %v1906_v33 = vld [vmem:[%s2052_s13 + $0xec] ss:$36 sps:$4 sm:$0xff]  }
  0x26   : > { %1586 = vmatpush3.bf16.msra.mxu0 %v1820_v26  ;;  %v1880_v14 = vld [vmem:[%s2290_s1 + $0x100] sm:$0xff]   ;;  %v1885_v18 = vld [vmem:[%s2052_s13 + $0x18] ss:$36 sps:$4 sm:$0xff]   ;;  %v1889_v21 = vld [vmem:[%s2290_s1 + $0x230] sm:$0xff]  }
  0x27   : > { %1626 = vmatpush3.bf16.msra.mxu1 %v1821_v27  ;;  %1587 = vmatprep.subr.bf16.mxu0 %v1822_v28  ;;  %v1881_v15 = vld [vmem:[%s2290_s1 + $0x180] sm:$0xff]   ;;  %v1888_v20 = vld [vmem:[%s2290_s1 + $0x238] sm:$0xff]   ;;  %v1896_v26 = vld [vmem:[%s2290_s1 + $0x228] sm:$0xff]  }
  0x28   : > { %1627 = vmatprep.subr.bf16.mxu1 %v1823_v29  ;;  %v1887_v19 = vld [vmem:[%s2052_s13 + $0x1c] ss:$36 sps:$4 sm:$0xff]   ;;  %v1892_v23 = vld [vmem:[%s2052_s13 + $0x64] ss:$36 sps:$4 sm:$0xff]   ;;  %v1900_v28 = vld [vmem:[%s2052_s13 + $0xac] ss:$36 sps:$4 sm:$0xff]  }
  0x29   : > { %v1890_v22 = vld [vmem:[%s2052_s13 + $0x5c] ss:$36 sps:$4 sm:$0xff]   ;;  %v1898_v27 = vld [vmem:[%s2052_s13 + $0xa4] ss:$36 sps:$4 sm:$0xff]   ;;  %v1905_v35 = vld [vmem:[%s2290_s1 + $0x210] sm:$0xff]  }
  0x2a   : > { %1588 = vmatpush3.bf16.msra.mxu0 %v1824_v30  ;;  %v1894_v24 = vld [vmem:[%s2052_s13 + $0x58] ss:$36 sps:$4 sm:$0xff]   ;;  %v1895_v25 = vld [vmem:[%s2052_s13 + $0x60] ss:$36 sps:$4 sm:$0xff]  }
  0x2b   : > { %1628 = vmatpush3.bf16.msra.mxu1 %v1825_v31  ;;  %1653 = vmatprep.subr.bf16.mxu0 %v1832_v36  ;;  %v1897_v29 = vld [vmem:[%s2290_s1 + $0x220] sm:$0xff]   ;;  %v1903_v31 = vld [vmem:[%s2052_s13 + $0xa8] ss:$36 sps:$4 sm:$0xff]  }
  0x2c   : > { %1693 = vmatprep.subr.bf16.mxu1 %v1833_v37  ;;  %v1902_v30 = vld [vmem:[%s2052_s13 + $0xa0] ss:$36 sps:$4 sm:$0xff]   ;;  %v1910_v36 = vld [vmem:[%s2052_s13 + $0xe8] ss:$36 sps:$4 sm:$0xff]  }
  0x2d   : > { %1018 = vmatmul.mubr.bf16.vlgmr.msra.gmra.mxu0 %v1826_v32  ;;  %v1904_v32 = vld [vmem:[%s2290_s1 + $0x218] sm:$0xff]   ;;  %v1912_v37 = vld [vmem:[%s2290_s1 + $0x208] sm:$0xff]  }
  0x2e   : > { %1083 = vmatmul.mubr.bf16.vlgmr.msra.gmra.mxu1 %v1829_v34  ;;  %1654 = vmatpush3.bf16.msra.mxu0 %v1834_v38  ;;  %v1908_v34 = vld [vmem:[%s2052_s13 + $0xf4] ss:$36 sps:$4 sm:$0xff]  }
  0x2f   : > { %1694 = vmatpush3.bf16.msra.mxu1 %v1835_v39  ;;  %1655 = vmatprep.subr.bf16.mxu0 %v1836_v40  ;;  %v1911_v38 = vld [vmem:[%s2052_s13 + $0xf0] ss:$36 sps:$4 sm:$0xff]   ;;  %v1914_v39 = vld [vmem:[%s2052_s13 + $0x20] ss:$36 sps:$4 sm:$0xff]  }
  0x30   : > { %1695 = vmatprep.subr.bf16.mxu1 %v1837_v41  ;;  %1025 = vmatprep.mubr.bf16.mxu0 %v1840_v44  ;;  %v1915_v40 = vld [vmem:[%s2052_s13 + $0xb0] ss:$36 sps:$4 sm:$0xff]   ;;  %v1913_v41 = vld [vmem:[%s2290_s1 + $0x200] sm:$0xff]  }
  0x31   : > { %1090 = vmatprep.mubr.bf16.mxu1 %v1842_v45 }
  0x32   : > { %1656 = vmatpush3.bf16.msra.mxu0 %v1838_v42  ;;  %v1916_v42 = vld [vmem:[%s2052_s13 + $0x68] ss:$36 sps:$4 sm:$0xff]  }
  0x33   : > { %1696 = vmatpush3.bf16.msra.mxu1 %v1839_v43  ;;  %1657 = vmatprep.subr.bf16.mxu0 %v1846_v48  ;;  %v1917_v43 = vld [vmem:[%s2052_s13 + $0xf8] ss:$36 sps:$4 sm:$0xff]  }
  0x34   : > { %1697 = vmatprep.subr.bf16.mxu1 %v1847_v49 }
  0x35   : > { %1026 = vmatmul.mubr.bf16.gmra.mxu0 %v1844_v46 }
  0x36   : > { %1091 = vmatmul.mubr.bf16.gmra.mxu1 %v1845_v47  ;;  %1658 = vmatpush3.bf16.msra.mxu0 %v1848_v50 }
  0x37   : > { %1698 = vmatpush3.bf16.msra.mxu1 %v1849_v51  ;;  %1659 = vmatprep.subr.bf16.mxu0 %v1850_v52 }
  0x38   : > { %1699 = vmatprep.subr.bf16.mxu1 %v1851_v53  ;;  %1033 = vmatprep.mubr.bf16.mxu0 %v1854_v56 }
  0x39   : > { %1098 = vmatprep.mubr.bf16.mxu1 %v1856_v57 }
  0x3a   : > { %1660 = vmatpush3.bf16.msra.mxu0 %v1852_v54 }
  0x3b   : > { %1700 = vmatpush3.bf16.msra.mxu1 %v1853_v55  ;;  %1661 = vmatprep.subr.bf16.mxu0 %v1860_v60 }
  0x3c   : > { %1701 = vmatprep.subr.bf16.mxu1 %v1861_v61 }
  0x3d   : > { %1034 = vmatmul.mubr.bf16.gmra.mxu0 %v1858_v58 }
  0x3e   : > { %1099 = vmatmul.mubr.bf16.gmra.mxu1 %v1859_v59  ;;  %1662 = vmatpush3.bf16.msra.mxu0 %v1862_v62 }
  0x3f   : > { %1702 = vmatpush3.bf16.msra.mxu1 %v1863_v63  ;;  %1663 = vmatprep.subr.bf16.mxu0 %v1864_v0 }
  0x40   : > { %1703 = vmatprep.subr.bf16.mxu1 %v1865_v1  ;;  %1041 = vmatprep.mubr.bf16.mxu0 %v1868_v4 }
  0x41   : > { %1106 = vmatprep.mubr.bf16.mxu1 %v1870_v5 }
  0x42   : > { %1664 = vmatpush3.bf16.msra.mxu0 %v1866_v2 }
  0x43   : > { %1704 = vmatpush3.bf16.msra.mxu1 %v1867_v3  ;;  %1665 = vmatprep.subr.bf16.mxu0 %v1874_v8 }
  0x44   : > { %1705 = vmatprep.subr.bf16.mxu1 %v1875_v9 }
  0x45   : > { %1042 = vmatmul.mubr.bf16.gmra.mxu0 %v1872_v6 }
  0x46   : > { %1107 = vmatmul.mubr.bf16.gmra.mxu1 %v1873_v7  ;;  %1666 = vmatpush3.bf16.msra.mxu0 %v1876_v10 }
  0x47   : > { %1706 = vmatpush3.bf16.msra.mxu1 %v1877_v11  ;;  %1667 = vmatprep.subr.bf16.mxu0 %v1878_v12 }
  0x48   : > { %1707 = vmatprep.subr.bf16.mxu1 %v1879_v13  ;;  %1147 = vmatprep.mubr.bf16.mxu0 %v1884_v17 }
  0x49   : > { %1212 = vmatprep.mubr.bf16.mxu1 %v1887_v19 }
  0x4a   : > { %1668 = vmatpush3.bf16.msra.mxu0 %v1880_v14 }
  0x4b   : > { %1708 = vmatpush3.bf16.msra.mxu1 %v1881_v15  ;;  %1745 = vmatprep.subr.bf16.mxu0 %v1888_v20 }
  0x4c   : > { %1769 = vmatprep.subr.bf16.mxu1 %v1888_v20 }
  0x4d   : > { %1148 = vmatmul.mubr.bf16.vlgmr.msra.gmra.mxu0 %v1882_v16 }
  0x4e   : > { %1213 = vmatmul.mubr.bf16.vlgmr.msra.gmra.mxu1 %v1885_v18  ;;  %1746 = vmatpush3.bf16.msra.mxu0 %v1888_v20 }
  0x4f   : > { %1777 = vmatpush3.bf16.msra.mxu1 %v1888_v20  ;;  %1747 = vmatprep.subr.bf16.mxu0 %v1889_v21 }
  0x50   : > { %1770 = vmatprep.subr.bf16.mxu1 %v1889_v21  ;;  %1155 = vmatprep.mubr.bf16.mxu0 %v1890_v22 }
  0x51   : > { %1220 = vmatprep.mubr.bf16.mxu1 %v1892_v23 }
  0x52   : > { %1748 = vmatpush3.bf16.msra.mxu0 %v1889_v21 }
  0x53   : > { %1778 = vmatpush3.bf16.msra.mxu1 %v1889_v21  ;;  %1749 = vmatprep.subr.bf16.mxu0 %v1896_v26 }
  0x54   : > { %1771 = vmatprep.subr.bf16.mxu1 %v1896_v26 }
  0x55   : > { %1156 = vmatmul.mubr.bf16.gmra.mxu0 %v1894_v24 }
  0x56   : > { %1221 = vmatmul.mubr.bf16.gmra.mxu1 %v1895_v25  ;;  %1163 = vmatprep.mubr.bf16.mxu0 %v1898_v27 }
  0x57   : > { %1750 = vmatpush3.bf16.msra.mxu0 %v1896_v26  ;;  %1228 = vmatprep.mubr.bf16.mxu1 %v1900_v28 }
  0x58   : > { %1779 = vmatpush3.bf16.msra.mxu1 %v1896_v26  ;;  %1751 = vmatprep.subr.bf16.mxu0 %v1897_v29 }
  0x59   : > { %1772 = vmatprep.subr.bf16.mxu1 %v1897_v29 }
  0x5b   : > { %1752 = vmatpush3.bf16.msra.mxu0 %v1897_v29 }
  0x5c   : > { %1780 = vmatpush3.bf16.msra.mxu1 %v1897_v29  ;;  %1753 = vmatprep.subr.bf16.mxu0 %v1904_v32 }
  0x5d   : > { %1164 = vmatmul.mubr.bf16.gmra.mxu0 %v1902_v30  ;;  %1773 = vmatprep.subr.bf16.mxu1 %v1904_v32  ;;  %v1423_v30 = vld [vmem:[%s2291_s2] ss:$0 sm:$0xff] }
  0x5e   : > { %1229 = vmatmul.mubr.bf16.gmra.mxu1 %v1903_v31  ;;  %1171 = vmatprep.mubr.bf16.mxu0 %v1906_v33 }
  0x5f   : > { %1754 = vmatpush3.bf16.msra.mxu0 %v1904_v32  ;;  %1236 = vmatprep.mubr.bf16.mxu1 %v1908_v34 }
  0x60   : > { %1781 = vmatpush3.bf16.msra.mxu1 %v1904_v32  ;;  %1755 = vmatprep.subr.bf16.mxu0 %v1905_v35 }
  0x61   : > { %1774 = vmatprep.subr.bf16.mxu1 %v1905_v35 }
  0x63   : > { %1756 = vmatpush3.bf16.msra.mxu0 %v1905_v35 }
  0x64   : > { %1782 = vmatpush3.bf16.msra.mxu1 %v1905_v35  ;;  %1757 = vmatprep.subr.bf16.mxu0 %v1912_v37 }
  0x65   : > { %1172 = vmatmul.mubr.bf16.gmra.mxu0 %v1910_v36  ;;  %1775 = vmatprep.subr.bf16.mxu1 %v1912_v37 }
  0x66   : > { %1237 = vmatmul.mubr.bf16.gmra.mxu1 %v1911_v38  ;;  %1761 = vmatprep.mubr.bf16.mxu0 %v1914_v39 }
  0x67   : > { %1758 = vmatpush3.bf16.msra.mxu0 %v1912_v37  ;;  %1765 = vmatprep.mubr.bf16.mxu1 %v1915_v40 }
  0x68   : > { %1783 = vmatpush3.bf16.msra.mxu1 %v1912_v37  ;;  %1759 = vmatprep.subr.bf16.mxu0 %v1913_v41 }
  0x69   : > { %1776 = vmatprep.subr.bf16.mxu1 %v1913_v41 }
  0x6b   : > { %1760 = vmatpush3.bf16.msra.mxu0 %v1913_v41 }
  0x6c   : > { %1784 = vmatpush3.bf16.msra.mxu1 %v1913_v41 }
  0x6e   : > { %1762 = vmatmul.mubr.bf16.vlgmr.msra.gmra.mxu0 %v1916_v42 }
  0x6f   : > { %1766 = vmatmul.mubr.bf16.vlgmr.msra.gmra.mxu1 %v1917_v43 }
  0xed   : > { %v1589_v44 = vpop.f32.mrf.mxu0 }
  0xee   : > { %v1629_v45 = vpop.f32.mrf.mxu1 }
  0xef   : > { %v1590_v46 = vpop.f32.mrf.mxu0 }
  0xf0   : > { %v1630_v47 = vpop.f32.mrf.mxu1  ;;  %v1591_v29 = vadd.f32 %v1590_v46, %v1589_v44 }
  0xf1   : > { %v1592_v48 = vpop.f32.mrf.mxu0  ;;  %v1631_v42 = vadd.f32 %v1630_v47, %v1629_v45 }
  0xf2   : > { %v2216_v49 = vpop.f32.mrf.mxu1  ;;  %v1020_v38 = vadd.f32 %v1591_v29, %v1423_v30 }
  0xf3   : > { %v1593_v50 = vpop.f32.mrf.mxu0 }
  0xf4   : > { %v2218_v51 = vpop.f32.mrf.mxu1  ;;  %v1594_v33 = vadd.f32 %v1593_v50, %v1592_v48 }
  0xf5   : > { %v1595_v52 = vpop.f32.mrf.mxu0  ;;  %v1634_v50 = vadd.f32 %v2218_v51, %v2216_v49 }
  0xf6   : > { %v2220_v53 = vpop.f32.mrf.mxu1  ;;  %v1023_v44 = vadd.f32 %v1594_v33, %v1423_v30 }
  0xf7   : > { %v1596_v54 = vpop.f32.mrf.mxu0 }
  0xf8   : > { %v1636_v55 = vpop.f32.mrf.mxu1  ;;  %v1597_v34 = vadd.f32 %v1596_v54, %v1595_v52 }
  0xf9   : > { %v1598_v56 = vpop.f32.mrf.mxu0  ;;  %v1637_v52 = vadd.f32 %v1636_v55, %v2220_v53 }
  0xfa   : > { %v2222_v57 = vpop.f32.mrf.mxu1  ;;  %v1028_v46 = vadd.f32 %v1597_v34, %v1423_v30 }
  0xfb   : > { %v1599_v58 = vpop.f32.mrf.mxu0 }
  0xfc   : > { %v2224_v59 = vpop.f32.mrf.mxu1  ;;  %v1600_v39 = vadd.f32 %v1599_v58, %v1598_v56 }
  0xfd   : > { %v1601_v60 = vpop.f32.mrf.mxu0  ;;  %v1640_v45 = vadd.f32 %v2224_v59, %v2222_v57 }
  0xfe   : > { %v2226_v61 = vpop.f32.mrf.mxu1  ;;  %v1031_v48 = vadd.f32 %v1600_v39, %v1423_v30 }
  0xff   : > { %v1602_v62 = vpop.f32.mrf.mxu0 }
 0x100   : > { %v2228_v63 = vpop.f32.mrf.mxu1 }
 0x101   : > { %v1604_v0 = vpop.f32.mrf.mxu0  ;;  %v1643_v55 = vadd.f32 %v2228_v63, %v2226_v61 }
 0x102   : > { %v2230_v1 = vpop.f32.mrf.mxu1 }
 0x103   : > { %v1605_v2 = vpop.f32.mrf.mxu0 }
 0x104   : > { %v2232_v3 = vpop.f32.mrf.mxu1  ;;  %v1606_v54 = vadd.f32 %v1605_v2, %v1604_v0 }
 0x105   : > { %v1607_v4 = vpop.f32.mrf.mxu0 }
 0x106   : > { %v1647_v5 = vpop.f32.mrf.mxu1  ;;  %v1039_v0 = vadd.f32 %v1606_v54, %v1423_v30 }
 0x107   : > { %v1608_v6 = vpop.f32.mrf.mxu0 }
 0x108   : > { %v1648_v7 = vpop.f32.mrf.mxu1  ;;  %v1609_v35 = vadd.f32 %v1608_v6, %v1607_v4 }
 0x109   : > { %v1610_v8 = vpop.f32.mrf.mxu0  ;;  %v1649_v56 = vadd.f32 %v1648_v7, %v1647_v5 }
 0x10a   : > { %v1650_v9 = vpop.f32.mrf.mxu1 }
 0x10b   : > { %v1611_v10 = vpop.f32.mrf.mxu0 }
 0x10c   : > { %v1651_v11 = vpop.f32.mrf.mxu1  ;;  %v1612_v43 = vadd.f32 %v1611_v10, %v1610_v8  ;;  %v1093_v8 = vadd.f32 %v1637_v52, %v1028_v46 }
 0x10d   : > { %v1669_v12 = vpop.f32.mrf.mxu0  ;;  %v1652_v49 = vadd.f32 %v1651_v11, %v1650_v9 }
 0x10e   : > { %v2234_v13 = vpop.f32.mrf.mxu1  ;;  %v1047_v47 = vadd.f32 %v1612_v43, %v1423_v30 }
 0x10f   : > { %v1670_v14 = vpop.f32.mrf.mxu0 }
 0x110   : > { %v2236_v15 = vpop.f32.mrf.mxu1  ;;  %v1671_v51 = vadd.f32 %v1670_v14, %v1669_v12  ;;  %v1112_v7 = vadd.f32 %v1652_v49, %v1047_v47 }
 0x111   : > { %v2238_v16 = vpop.f32.mrf.mxu0 }
 0x112   : > { %v2240_v17 = vpop.f32.mrf.mxu1 }
 0x113   : > { %2293 = vst [vmem:[#allocation2_spill] sm:$0xff] %v2240_v17  ;;  %v1673_v18 = vpop.f32.mrf.mxu0  ;;  %v1044_v17 = vadd.f32 %v1609_v35, %v1423_v30  ;;  %v1096_v35 = vadd.f32 %v1640_v45, %v1031_v48 }
 0x114   : > { %v2242_v19 = vpop.f32.mrf.mxu1 }
 0x115   : > { %2294 = vst [vmem:[#allocation3_spill] sm:$0xff] %v2242_v19  ;;  %v1675_v20 = vpop.f32.mrf.mxu0  ;;  %v1603_v19 = vadd.f32 %v1602_v62, %v1601_v60  ;;  %v1088_v62 = vadd.f32 %v1634_v50, %v1023_v44  ;;  %v1109_v29 = vadd.f32 %v1649_v56, %v1044_v17 }
 0x116   : > { %v2244_v21 = vpop.f32.mrf.mxu1 }
 0x117   : > { %v1676_v22 = vpop.f32.mrf.mxu0  ;;  %v1036_v10 = vadd.f32 %v1603_v19, %v1423_v30 }
 0x118   : > { %v2246_v23 = vpop.f32.mrf.mxu1  ;;  %v1677_v6 = vadd.f32 %v1676_v22, %v1675_v20  ;;  %v1674_v20 = vadd.f32 %v1673_v18, %v2238_v16  ;;  %v1711_v18 = vadd.f32 %v2236_v15, %v2234_v13 }
 0x119   : > { %v1678_v24 = vpop.f32.mrf.mxu0  ;;  %v1101_v17 = vadd.f32 %v1643_v55, %v1036_v10  ;;  %v1717_v61 = vadd.f32 %v2246_v23, %v2244_v21 }
 0x11a   : > { %v2248_v25 = vpop.f32.mrf.mxu1  ;;  %v1158_v22 = vadd.f32 %v1677_v6, %v1093_v8  ;;  %v2301_v44 = vld [vmem:[#allocation2_spill] sm:$0xff] }
 0x11b   : > { %2295 = vst [vmem:[#allocation4_spill] sm:$0xff] %v2248_v25  ;;  %v1679_v26 = vpop.f32.mrf.mxu0  ;;  %v1085_v25 = vadd.f32 %v1631_v42, %v1020_v38  ;;  %v1153_v38 = vadd.f32 %v1674_v20, %v1088_v62 }
 0x11c   : > { %v2250_v27 = vpop.f32.mrf.mxu1  ;;  %v1680_v53 = vadd.f32 %v1679_v26, %v1678_v24  ;;  %v2302_v46 = vld [vmem:[#allocation3_spill] sm:$0xff] }
 0x11d   : > { %2296 = vst [vmem:[#allocation5_spill] sm:$0xff] %v2250_v27  ;;  %v1681_v28 = vpop.f32.mrf.mxu0  ;;  %v1150_v14 = vadd.f32 %v1671_v51, %v1085_v25  ;;  %v1714_v48 = vadd.f32 %v2302_v46, %v2301_v44 }
 0x11e   : > { %v2255_v31 = vpop.f32.mrf.mxu1  ;;  %v1161_v63 = vadd.f32 %v1680_v53, %v1096_v35 }
 0x11f   : > { %2297 = vst [vmem:[#allocation6_spill] sm:$0xff] %v2255_v31  ;;  %v1682_v32 = vpop.f32.mrf.mxu0  ;;  %v1215_v52 = vadd.f32 %v1711_v18, %v1150_v14 }
 0x120   : > { %v2257_v36 = vpop.f32.mrf.mxu1  ;;  %v1683_v2 = vadd.f32 %v1682_v32, %v1681_v28 }
 0x121   : > { %v1684_v37 = vpop.f32.mrf.mxu0 }
 0x122   : > { %v2259_v40 = vpop.f32.mrf.mxu1  ;;  %v1166_v28 = vadd.f32 %v1683_v2, %v1101_v17  ;;  %v2298_v39 = vld [vmem:[#allocation4_spill] sm:$0xff] }
 0x123   : > { %v1685_v41 = vpop.f32.mrf.mxu0 }
 0x124   : > { %v1725_v27 = vpop.f32.mrf.mxu1  ;;  %v1686_v9 = vadd.f32 %v1685_v41, %v1684_v37  ;;  %v1223_v37 = vadd.f32 %v1717_v61, %v1158_v22 }
 0x125   : > { %v1687_v31 = vpop.f32.mrf.mxu0  ;;  %v1726_v15 = vadd.f32 %v1725_v27, %v2259_v40 }
 0x126   : > { %v1727_v58 = vpop.f32.mrf.mxu1  ;;  %v2300_v41 = vld [vmem:[#allocation6_spill] sm:$0xff] }
 0x127   : > { %v1688_v4 = vpop.f32.mrf.mxu0  ;;  %v1723_v21 = vadd.f32 %v2257_v36, %v2300_v41  ;;  %v1218_v36 = vadd.f32 %v1714_v48, %v1153_v38 }
 0x128   : > { %v1689_v60 = vadd.f32 %v1688_v4, %v1687_v31  ;;  %v1728_v33 = vpop.f32.mrf.mxu1  ;;  %v1646_v31 = vadd.f32 %v2232_v3, %v2230_v1  ;;  %v2299_v1 = vld [vmem:[#allocation5_spill] sm:$0xff] }
 0x129   : > { %v1690_v34 = vpop.f32.mrf.mxu0  ;;  %v1729_v11 = vadd.f32 %v1728_v33, %v1727_v58  ;;  %v1720_v3 = vadd.f32 %v2299_v1, %v2298_v39  ;;  %v1231_v58 = vadd.f32 %v1723_v21, %v1166_v28 }
 0x12a   : > { %v1174_v5 = vadd.f32 %v1689_v60, %v1109_v29  ;;  %v1730_v57 = vpop.f32.mrf.mxu1  ;;  %v1104_v26 = vadd.f32 %v1646_v31, %v1039_v0 }
 0x12b   : > { %v1691_v59 = vpop.f32.mrf.mxu0  ;;  %v1226_v13 = vadd.f32 %v1720_v3, %v1161_v63 }
 0x12c   : > { %v1692_v19 = vadd.f32 %v1691_v59, %v1690_v34  ;;  %v1731_v12 = vpop.f32.mrf.mxu1  ;;  %v1239_v16 = vadd.f32 %v1729_v11, %v1174_v5  ;;  %v1169_v23 = vadd.f32 %v1686_v9, %v1104_v26 }
 0x12d   : > { %v1732_v30 = vadd.f32 %v1731_v12, %v1730_v57 }
 0x12e   : > { %v1177_v24 = vadd.f32 %v1692_v19, %v1112_v7  ;;  %v1763_v32 = vpop.f32.mrf.mxu0  ;;  %v1234_v10 = vadd.f32 %v1726_v15, %v1169_v23 }
 0x12f   : > { %v1767_v25 = vpop.f32.mrf.mxu1  ;;  %v1288_v50 = vadd.f32 %v1763_v32, %v1223_v37 }
 0x130   : > { %v1279_v42 = vpop.f32.mrf.mxu0  ;;  %v1242_v43 = vadd.f32 %v1732_v30, %v1177_v24  ;;  %v1304_v56 = vadd.f32 %v1767_v25, %v1239_v16 }
 0x131   : > { %v1295_v54 = vpop.f32.mrf.mxu1  ;;  %v1280_v45 = vadd.f32 %v1279_v42, %v1215_v52  ;;  %v1312_v29 = vmax.f32 %v1288_v50, 0.0 }
 0x132   : > { %v1764_v4 = vpop.f32.mrf.mxu0  ;;  %v1296_v60 = vadd.f32 %v1295_v54, %v1231_v58  ;;  %v1316_v49 = vmax.f32 %v1304_v56, 0.0 }
 0x133   : > { %v1291_v47 = vadd.f32 %v1764_v4, %v1226_v13  ;;  %v1768_v6 = vpop.f32.mrf.mxu1  ;;  %v1310_v51 = vmax.f32 %v1280_v45, 0.0 }
 0x134   : > { %v1307_v62 = vadd.f32 %v1768_v6, %v1242_v43  ;;  %v1282_v8 = vpop.f32.mrf.mxu0  ;;  %v1314_v0 = vmax.f32 %v1296_v60, 0.0 }
 0x135   : > { %v1313_v33 = vmax.f32 %v1291_v47, 0.0  ;;  %v1283_v34 = vadd.f32 %v1282_v8, %v1218_v36  ;;  %v1298_v35 = vpop.f32.mrf.mxu1 }
 0x136   : > { %v1317_v27 = vmax.f32 %v1307_v62, 0.0  ;;  %v1299_v40 = vadd.f32 %v1298_v35, %v1234_v10 }
 0x137   : > { %v1558_v53 = vpack.c.bf16 %v1313_v33, %v1312_v29  ;;  %v1311_v55 = vmax.f32 %v1283_v34, 0.0 }
 0x138   : > { %v1568_v2 = vpack.c.bf16 %v1317_v27, %v1316_v49  ;;  %v1315_v5 = vmax.f32 %v1299_v40, 0.0 }
 0x139   : > { %1570 = vst [vmem:[%s175_s20 + $0x8] sm:$0xff] %v1558_v53   ;;  %v1553_v57 = vpack.c.bf16 %v1311_v55, %v1310_v51 }
 0x13a   : > { %1572 = vst [vmem:[%s175_s20 + $0x18] sm:$0xff] %v1568_v2   ;;  %v1563_v59 = vpack.c.bf16 %v1315_v5, %v1314_v0 }
 0x13b   : > { %1554 = vst [vmem:[%s175_s20] sm:$0xff] %v1553_v57  }
 0x13c   : > { %1571 = vst [vmem:[%s175_s20 + $0x10] sm:$0xff] %v1563_v59  }
 0x13d PF: > { %s13_s12 = sadd.s32 1, %s1924_s12  }
 0x13e   : > { %p10_p4 = scmp.ge.s32.totalorder %s13_s12, 4  }
 0x140   :  { %12 = sbr.rel (!%p10_p4) target bundleno = 1 (0x1), region = 62 }

// kernel: tinycar_combo_forward.8
= control target key start
LH: loop header
LB: loop body
LE: loop exit
PB: predicated region body
PF: predicated region fallthrough
CT: control target
= control target key end

     0   :  { %s1435_s12 = smov 0   ;;  %s1688_s0 = inlined_call_operand.vmem [shape: bf16[32,1152], index: 0, kind: input, shape index: {}]   ;;  %s1689_s1 = inlined_call_operand.vmem [shape: bf16[1152,128], index: 1, kind: input, shape index: {}]   ;;  %s1690_s2 = inlined_call_operand.vmem [shape: f32[1,128], index: 2, kind: input, shape index: {}]   ;;  %s1691_s3 = inlined_call_operand.vmem [shape: bf16[32,128], index: 3, kind: output, shape index: {}]  }
   0x1 LB: > { %s1090_s13 = sadd.s32 4294967295, %s1411_s12   ;;  %p1094_p0 = scmp.ge.s32.totalorder %s1411_s12, 1  ;;  %s1411_s12 = sphi %s1435_s12, %s13_s12  }
   0x2   : > { %p139_p1 = scmp.lt.s32.totalorder %s1411_s12, 3 }
   0x4   : > { %p140_p2 = pnand %p1094_p0, %p139_p1 }
   0x5   : > { %s1095_s17 = sshll.u32 (!%p140_p2), %s1090_s13, 1 }
   0x6   : > { %143 = sbr.rel (%p140_p2) target bundleno = 312 (0x138), region = 32  ;;  %p165_p3 = scmp.lt.s32.totalorder (!%p140_p2), %s1095_s17, 3 }
   0xb   : > { %v1320_v0 = vld [vmem:[%s1689_s1 + $0x78] sm:$0xff]   ;;  %v1324_v4 = vld [vmem:[%s1689_s1 + $0x70] sm:$0xff]   ;;  %v1328_v8 = vld [vmem:[%s1689_s1 + $0x68] sm:$0xff]   ;;  %s1693_s17 = smov (!%p165_p3, %s1095_s17), 3  ;;  %vm1414_vm0 = vmmov 0  }
   0xc   : > { %v1321_v1 = vld [vmem:[%s1689_s1 + $0x38] sm:$0xff]   ;;  %1192 = vmatprep.subr.bf16.mxu0 %v1320_v0  ;;  %v1325_v5 = vld [vmem:[%s1689_s1 + $0x30] sm:$0xff]   ;;  %v1329_v9 = vld [vmem:[%s1689_s1 + $0x28] sm:$0xff]   ;;  %s1309_s14 = smul.u32 36, %s1693_s17 }
   0xd   : > { %v1322_v2 = vld [vmem:[%s1689_s1 + $0xf8] sm:$0xff]   ;;  %1193 = vmatpush3.bf16.msra.mxu0 %v1321_v1  ;;  %v1326_v6 = vld [vmem:[%s1689_s1 + $0xf0] sm:$0xff]   ;;  %v1330_v10 = vld [vmem:[%s1689_s1 + $0xe8] sm:$0xff]  }
   0xe   : > { %v1323_v3 = vld [vmem:[%s1689_s1 + $0xb8] sm:$0xff]   ;;  %1214 = vmatprep.subr.bf16.mxu1 %v1322_v2  ;;  %1194 = vmatprep.subr.bf16.mxu0 %v1324_v4  ;;  %v1327_v7 = vld [vmem:[%s1689_s1 + $0xb0] sm:$0xff]   ;;  %v1331_v11 = vld [vmem:[%s1689_s1 + $0xa8] sm:$0xff]   ;;  %s1538_s13 = scalar_lea.vmem %s1688_s0, %s1309_s14 }
   0xf   : > { %1215 = vmatpush3.bf16.msra.mxu1 %v1323_v3  ;;  %v1332_v12 = vld [vmem:[%s1689_s1 + $0x60] sm:$0xff]   ;;  %v1336_v16 = vld [vmem:[%s1689_s1 + $0x58] sm:$0xff]   ;;  %v1340_v20 = vld [vmem:[%s1689_s1 + $0x50] sm:$0xff]  }
  0x10   : > { %1216 = vmatprep.subr.bf16.mxu1 %v1326_v6  ;;  %v1333_v13 = vld [vmem:[%s1689_s1 + $0x20] sm:$0xff]   ;;  %v1337_v17 = vld [vmem:[%s1689_s1 + $0x18] sm:$0xff]   ;;  %v1341_v21 = vld [vmem:[%s1689_s1 + $0x10] sm:$0xff]   ;;  %v1413_v6 = vmov 0.0  }
  0x11   : > { %1195 = vmatpush3.bf16.msra.mxu0 %v1325_v5  ;;  %v1334_v14 = vld [vmem:[%s1689_s1 + $0xe0] sm:$0xff]   ;;  %v1338_v18 = vld [vmem:[%s1689_s1 + $0xd8] sm:$0xff]   ;;  %v1342_v22 = vld [vmem:[%s1689_s1 + $0xd0] sm:$0xff]  }
  0x12   : > { %1196 = vmatprep.subr.bf16.mxu0 %v1328_v8  ;;  %v1335_v15 = vld [vmem:[%s1689_s1 + $0xa0] sm:$0xff]   ;;  %v1339_v19 = vld [vmem:[%s1689_s1 + $0x98] sm:$0xff]   ;;  %v1343_v23 = vld [vmem:[%s1689_s1 + $0x90] sm:$0xff]  }
  0x13   : > { %1217 = vmatpush3.bf16.msra.mxu1 %v1327_v7  ;;  %v1344_v24 = vld [vmem:[%s1689_s1 + $0x48] sm:$0xff]   ;;  %v1348_v28 = vld [vmem:[%s1689_s1 + $0x40] sm:$0xff]   ;;  %v1355_v34 = vld [vmem:[%s1689_s1 + $0x178] sm:$0xff]  }
  0x14   : > { %1218 = vmatprep.subr.bf16.mxu1 %v1330_v10  ;;  %v1345_v25 = vld [vmem:[%s1689_s1 + $0x8] sm:$0xff]   ;;  %v1349_v29 = vld [vmem:[%s1689_s1] sm:$0xff]   ;;  %v1359_v37 = vld [vmem:[%s1689_s1 + $0x138] sm:$0xff]  }
  0x15   : > { %1197 = vmatpush3.bf16.msra.mxu0 %v1329_v9  ;;  %v1346_v26 = vld [vmem:[%s1689_s1 + $0xc8] sm:$0xff]   ;;  %v1350_v30 = vld [vmem:[%s1689_s1 + $0xc0] sm:$0xff]   ;;  %v1360_v38 = vld [vmem:[%s1689_s1 + $0x1f8] sm:$0xff]  }
  0x16   : > { %1198 = vmatprep.subr.bf16.mxu0 %v1332_v12  ;;  %v1347_v27 = vld [vmem:[%s1689_s1 + $0x88] sm:$0xff]   ;;  %v1351_v31 = vld [vmem:[%s1538_s13] ss:$36 sps:$4 sm:$0xff]   ;;  %v1361_v39 = vld [vmem:[%s1689_s1 + $0x1b8] sm:$0xff]  }
  0x17   : > { %1219 = vmatpush3.bf16.msra.mxu1 %v1331_v11  ;;  %v1353_v32 = vld [vmem:[%s1538_s13 + $0x4] ss:$36 sps:$4 sm:$0xff]   ;;  %v1358_v36 = vld [vmem:[%s1538_s13 + $0xc] ss:$36 sps:$4 sm:$0xff]   ;;  %v1374_v52 = vld [vmem:[%s1689_s1 + $0x158] sm:$0xff]  }
  0x18   : > { %1220 = vmatprep.subr.bf16.mxu1 %v1334_v14  ;;  %v1354_v33 = vld [vmem:[%s1689_s1 + $0x80] sm:$0xff]   ;;  %849 = vmatprep.mubr.bf16.mxu0 %v1353_v32  ;;  %v1356_v35 = vld [vmem:[%s1538_s13 + $0x8] ss:$36 sps:$4 sm:$0xff]   ;;  %v1362_v40 = vld [vmem:[%s1689_s1 + $0x170] sm:$0xff]  }
  0x19   : > { %1199 = vmatpush3.bf16.msra.mxu0 %v1333_v13  ;;  %890 = vmatprep.mubr.bf16.mxu1 %v1358_v36  ;;  %v1363_v41 = vld [vmem:[%s1689_s1 + $0x130] sm:$0xff]   ;;  %v1366_v44 = vld [vmem:[%s1689_s1 + $0x168] sm:$0xff]   ;;  %v1370_v48 = vld [vmem:[%s1689_s1 + $0x160] sm:$0xff]  }
  0x1a   : > { %1200 = vmatprep.subr.bf16.mxu0 %v1336_v16  ;;  %v1364_v42 = vld [vmem:[%s1689_s1 + $0x1f0] sm:$0xff]   ;;  %v1367_v45 = vld [vmem:[%s1689_s1 + $0x128] sm:$0xff]   ;;  %v1371_v49 = vld [vmem:[%s1689_s1 + $0x120] sm:$0xff]  }
  0x1b   : > { %1221 = vmatpush3.bf16.msra.mxu1 %v1335_v15  ;;  %v1365_v43 = vld [vmem:[%s1689_s1 + $0x1b0] sm:$0xff]   ;;  %v1368_v46 = vld [vmem:[%s1689_s1 + $0x1e8] sm:$0xff]   ;;  %v1372_v50 = vld [vmem:[%s1689_s1 + $0x1e0] sm:$0xff]  }
  0x1c   : > { %1222 = vmatprep.subr.bf16.mxu1 %v1338_v18  ;;  %v1369_v47 = vld [vmem:[%s1689_s1 + $0x1a8] sm:$0xff]   ;;  %v1373_v51 = vld [vmem:[%s1689_s1 + $0x1a0] sm:$0xff]   ;;  %v1375_v53 = vld [vmem:[%s1689_s1 + $0x118] sm:$0xff]  }
  0x1d   : > { %1201 = vmatpush3.bf16.msra.mxu0 %v1337_v17  ;;  %v1376_v54 = vld [vmem:[%s1689_s1 + $0x1d8] sm:$0xff]   ;;  %v1378_v56 = vld [vmem:[%s1689_s1 + $0x150] sm:$0xff]   ;;  %v1382_v60 = vld [vmem:[%s1689_s1 + $0x148] sm:$0xff]  }
  0x1e   : > { %1202 = vmatprep.subr.bf16.mxu0 %v1340_v20  ;;  %v1377_v55 = vld [vmem:[%s1689_s1 + $0x198] sm:$0xff]   ;;  %v1379_v57 = vld [vmem:[%s1689_s1 + $0x110] sm:$0xff]   ;;  %v1383_v61 = vld [vmem:[%s1689_s1 + $0x108] sm:$0xff]  }
  0x1f   : > { %1223 = vmatpush3.bf16.msra.mxu1 %v1339_v19  ;;  %v1380_v58 = vld [vmem:[%s1689_s1 + $0x1d0] sm:$0xff]   ;;  %v1384_v62 = vld [vmem:[%s1689_s1 + $0x1c8] sm:$0xff]   ;;  %v1386_v0 = vld [vmem:[%s1689_s1 + $0x140] sm:$0xff]  }
  0x20   : > { %1224 = vmatprep.subr.bf16.mxu1 %v1342_v22  ;;  %v1381_v59 = vld [vmem:[%s1689_s1 + $0x190] sm:$0xff]   ;;  %v1385_v63 = vld [vmem:[%s1689_s1 + $0x188] sm:$0xff]   ;;  %v1387_v1 = vld [vmem:[%s1689_s1 + $0x100] sm:$0xff]  }
  0x21   : > { %1203 = vmatpush3.bf16.msra.mxu0 %v1341_v21  ;;  %v1388_v2 = vld [vmem:[%s1689_s1 + $0x1c0] sm:$0xff]   ;;  %v1389_v3 = vld [vmem:[%s1538_s13 + $0x10] ss:$36 sps:$4 sm:$0xff]   ;;  %v1393_v7 = vld [vmem:[%s1538_s13 + $0x18] ss:$36 sps:$4 sm:$0xff]  }
  0x22   : > { %1204 = vmatprep.subr.bf16.mxu0 %v1344_v24  ;;  %v1391_v4 = vld [vmem:[%s1538_s13 + $0x14] ss:$36 sps:$4 sm:$0xff]   ;;  %v1392_v5 = vld [vmem:[%s1689_s1 + $0x180] sm:$0xff]   ;;  %v1398_v11 = vld [vmem:[%s1689_s1 + $0x228] sm:$0xff]  }
  0x23   : > { %1225 = vmatpush3.bf16.msra.mxu1 %v1343_v23  ;;  %v1395_v8 = vld [vmem:[%s1538_s13 + $0x1c] ss:$36 sps:$4 sm:$0xff]   ;;  %v1397_v10 = vld [vmem:[%s1689_s1 + $0x230] sm:$0xff]   ;;  %v1402_v15 = vld [vmem:[%s1689_s1 + $0x208] sm:$0xff]  }
  0x24   : > { %1226 = vmatprep.subr.bf16.mxu1 %v1346_v26  ;;  %v1396_v9 = vld [vmem:[%s1689_s1 + $0x238] sm:$0xff]   ;;  %v1399_v12 = vld [vmem:[%s1689_s1 + $0x220] sm:$0xff]   ;;  %v1401_v14 = vld [vmem:[%s1689_s1 + $0x210] sm:$0xff]  }
  0x25   : > { %1205 = vmatpush3.bf16.msra.mxu0 %v1345_v25  ;;  %v1400_v13 = vld [vmem:[%s1689_s1 + $0x218] sm:$0xff]   ;;  %v1403_v16 = vld [vmem:[%s1689_s1 + $0x200] sm:$0xff]  }
  0x26   : > { %1206 = vmatprep.subr.bf16.mxu0 %v1348_v28  ;;  %v1404_v17 = vld [vmem:[%s1538_s13 + $0x20] ss:$36 sps:$4 sm:$0xff]   ;;  %s1098_s13 = sshll.u32 %s1693_s17, 2 }
  0x27   : > { %1227 = vmatpush3.bf16.msra.mxu1 %v1347_v27  ;;  %s175_s20 = scalar_lea.vmem %s1691_s3, %s1098_s13 }
  0x28   : > { %1228 = vmatprep.subr.bf16.mxu1 %v1350_v30  ;;  %v1099_v30 = vld [vmem:[%s1690_s2] ss:$0 sm:$0xff] }
  0x29   : > { %1207 = vmatpush3.bf16.msra.mxu0 %v1349_v29 }
  0x2a   : > { %1236 = vmatprep.subr.bf16.mxu0 %v1355_v34 }
  0x2b   : > { %1229 = vmatpush3.bf16.msra.mxu1 %v1354_v33 }
  0x2c   : > { %850 = vmatmul.mubr.bf16.vlgmr.msra.gmra.mxu0 %v1351_v31  ;;  %1258 = vmatprep.subr.bf16.mxu1 %v1360_v38 }
  0x2d   : > { %1237 = vmatpush3.bf16.msra.mxu0 %v1359_v37  ;;  %931 = vmatprep.mubr.bf16.mxu0 %v1391_v4 }
  0x2e   : > { %891 = vmatmul.mubr.bf16.vlgmr.msra.gmra.mxu1 %v1356_v35  ;;  %1238 = vmatprep.subr.bf16.mxu0 %v1362_v40 }
  0x2f   : > { %1259 = vmatpush3.bf16.msra.mxu1 %v1361_v39  ;;  %972 = vmatprep.mubr.bf16.mxu1 %v1395_v8 }
  0x30   : > { %1260 = vmatprep.subr.bf16.mxu1 %v1364_v42 }
  0x31   : > { %1239 = vmatpush3.bf16.msra.mxu0 %v1363_v41 }
  0x32   : > { %1240 = vmatprep.subr.bf16.mxu0 %v1366_v44 }
  0x33   : > { %1261 = vmatpush3.bf16.msra.mxu1 %v1365_v43 }
  0x34   : > { %1262 = vmatprep.subr.bf16.mxu1 %v1368_v46 }
  0x35   : > { %1241 = vmatpush3.bf16.msra.mxu0 %v1367_v45 }
  0x36   : > { %1242 = vmatprep.subr.bf16.mxu0 %v1370_v48 }
  0x37   : > { %1263 = vmatpush3.bf16.msra.mxu1 %v1369_v47 }
  0x38   : > { %1264 = vmatprep.subr.bf16.mxu1 %v1372_v50 }
  0x39   : > { %1243 = vmatpush3.bf16.msra.mxu0 %v1371_v49 }
  0x3a   : > { %1244 = vmatprep.subr.bf16.mxu0 %v1374_v52 }
  0x3b   : > { %1265 = vmatpush3.bf16.msra.mxu1 %v1373_v51 }
  0x3c   : > { %1266 = vmatprep.subr.bf16.mxu1 %v1376_v54 }
  0x3d   : > { %1245 = vmatpush3.bf16.msra.mxu0 %v1375_v53 }
  0x3e   : > { %1246 = vmatprep.subr.bf16.mxu0 %v1378_v56 }
  0x3f   : > { %1267 = vmatpush3.bf16.msra.mxu1 %v1377_v55 }
  0x40   : > { %1268 = vmatprep.subr.bf16.mxu1 %v1380_v58 }
  0x41   : > { %1247 = vmatpush3.bf16.msra.mxu0 %v1379_v57 }
  0x42   : > { %1248 = vmatprep.subr.bf16.mxu0 %v1382_v60 }
  0x43   : > { %1269 = vmatpush3.bf16.msra.mxu1 %v1381_v59 }
  0x44   : > { %1270 = vmatprep.subr.bf16.mxu1 %v1384_v62 }
  0x45   : > { %1249 = vmatpush3.bf16.msra.mxu0 %v1383_v61 }
  0x46   : > { %1250 = vmatprep.subr.bf16.mxu0 %v1386_v0 }
  0x47   : > { %1271 = vmatpush3.bf16.msra.mxu1 %v1385_v63 }
  0x48   : > { %1272 = vmatprep.subr.bf16.mxu1 %v1388_v2 }
  0x49   : > { %1251 = vmatpush3.bf16.msra.mxu0 %v1387_v1 }
  0x4a   : > { %1289 = vmatprep.subr.bf16.mxu0 %v1413_v6 }
  0x4b   : > { %1273 = vmatpush3.bf16.msra.mxu1 %v1392_v5 }
  0x4c   : > { %932 = vmatmul.mubr.bf16.vlgmr.msra.gmra.mxu0 %v1389_v3 }
  0x4d   : > { %1305 = vmatprep.mubr.msk.bf16.mxu0 %vm1414_vm0, %v1413_v6  ;;  %1290 = vmatpush3.bf16.msra.mxu0 %v1396_v9 }
  0x4e   : > { %973 = vmatmul.mubr.bf16.vlgmr.msra.gmra.mxu1 %v1393_v7  ;;  %1291 = vmatprep.subr.bf16.mxu0 %v1413_v6 }
  0x51   : > { %1292 = vmatpush3.bf16.msra.mxu0 %v1397_v10 }
  0x52   : > { %1293 = vmatprep.subr.bf16.mxu0 %v1413_v6 }
  0x55   : > { %1294 = vmatpush3.bf16.msra.mxu0 %v1398_v11 }
  0x56   : > { %1295 = vmatprep.subr.bf16.mxu0 %v1413_v6 }
  0x59   : > { %1296 = vmatpush3.bf16.msra.mxu0 %v1399_v12 }
  0x5a   : > { %1297 = vmatprep.subr.bf16.mxu0 %v1413_v6 }
  0x5d   : > { %1298 = vmatpush3.bf16.msra.mxu0 %v1400_v13 }
  0x5e   : > { %1299 = vmatprep.subr.bf16.mxu0 %v1413_v6 }
  0x61   : > { %1300 = vmatpush3.bf16.msra.mxu0 %v1401_v14 }
  0x62   : > { %1301 = vmatprep.subr.bf16.mxu0 %v1413_v6 }
  0x65   : > { %1302 = vmatpush3.bf16.msra.mxu0 %v1402_v15 }
  0x66   : > { %1303 = vmatprep.subr.bf16.mxu0 %v1413_v6 }
  0x69   : > { %1304 = vmatpush3.bf16.msra.mxu0 %v1403_v16 }
  0x6c   : > { %1306 = vmatmul.mubr.bf16.vlgmr.msra.gmra.mxu0 %v1404_v17 }
  0xec   : > { %v1208_v18 = vpop.f32.mrf.mxu0 }
  0xee   : > { %v1209_v19 = vpop.f32.mrf.mxu0  ;;  %v1230_v20 = vpop.f32.mrf.mxu1 }
  0xef   : > { %v1210_v29 = vadd.f32 %v1209_v19, %v1208_v18 }
  0xf0   : > { %v1211_v21 = vpop.f32.mrf.mxu0  ;;  %v1231_v22 = vpop.f32.mrf.mxu1 }
  0xf1   : > { %v852_v34 = vadd.f32 %v1210_v29, %v1099_v30  ;;  %v1232_v35 = vadd.f32 %v1231_v22, %v1230_v20 }
  0xf2   : > { %v1212_v23 = vpop.f32.mrf.mxu0  ;;  %v1233_v24 = vpop.f32.mrf.mxu1 }
  0xf3   : > { %v1213_v33 = vadd.f32 %v1212_v23, %v1211_v21  ;;  %v893_v41 = vadd.f32 %v1232_v35, %v852_v34 }
  0xf4   : > { %v1234_v26 = vpop.f32.mrf.mxu1 }
  0xf5   : > { %v855_v38 = vadd.f32 %v1213_v33, %v1099_v30  ;;  %v1235_v39 = vadd.f32 %v1234_v26, %v1233_v24 }
  0xf7   : > { %v896_v44 = vadd.f32 %v1235_v39, %v855_v38 }
 0x10c   : > { %v1252_v25 = vpop.f32.mrf.mxu0 }
 0x10e   : > { %v1253_v27 = vpop.f32.mrf.mxu0  ;;  %v1274_v28 = vpop.f32.mrf.mxu1 }
 0x10f   : > { %v1254_v40 = vadd.f32 %v1253_v27, %v1252_v25 }
 0x110   : > { %v1255_v31 = vpop.f32.mrf.mxu0  ;;  %v1275_v32 = vpop.f32.mrf.mxu1 }
 0x111   : > { %v934_v45 = vadd.f32 %v1254_v40, %v893_v41  ;;  %v1276_v46 = vadd.f32 %v1275_v32, %v1274_v28 }
 0x112   : > { %v1256_v36 = vpop.f32.mrf.mxu0  ;;  %v1277_v37 = vpop.f32.mrf.mxu1 }
 0x113   : > { %v1257_v42 = vadd.f32 %v1256_v36, %v1255_v31  ;;  %v975_v50 = vadd.f32 %v1276_v46, %v934_v45 }
 0x114   : > { %v1278_v43 = vpop.f32.mrf.mxu1 }
 0x115   : > { %v937_v47 = vadd.f32 %v1257_v42, %v896_v44  ;;  %v1279_v48 = vadd.f32 %v1278_v43, %v1277_v37 }
 0x117   : > { %v978_v53 = vadd.f32 %v1279_v48, %v937_v47 }
 0x12c   : > { %v1015_v49 = vpop.f32.mrf.mxu0 }
 0x12d   : > { %v1016_v52 = vadd.f32 %v1015_v49, %v975_v50 }
 0x12e   : > { %v1307_v51 = vpop.f32.mrf.mxu0 }
 0x12f   : > { %v1022_v57 = vmax.f32 %v1016_v52, 0.0 }
 0x130   : > { %v1018_v54 = vpop.f32.mrf.mxu0 }
 0x131   : > { %v1019_v55 = vadd.f32 %v1018_v54, %v978_v53 }
 0x132   : > { %v1308_v56 = vpop.f32.mrf.mxu0 }
 0x133   : > { %v1023_v58 = vmax.f32 %v1019_v55, 0.0 }
 0x135   : > { %v1190_v59 = vpack.c.bf16 %v1023_v58, %v1022_v57 }
 0x137   : > { %1191 = vst [vmem:[%s175_s20] sm:$0xff] %v1190_v59  }
 0x138 PF: > { %s13_s12 = sadd.s32 1, %s1411_s12  }
 0x139   : > { %p10_p4 = scmp.ge.s32.totalorder %s13_s12, 4  }
 0x13b   :  { %12 = sbr.rel (!%p10_p4) target bundleno = 1 (0x1), region = 62 }

// kernel: tinycar_combo_forward.9
= control target key start
LH: loop header
LB: loop body
LE: loop exit
PB: predicated region body
PF: predicated region fallthrough
CT: control target
= control target key end

     0   :  { %vm1125_vm0 = vmmov 0   ;;  %s1383_s1 = inlined_call_operand.vmem [shape: bf16[1152,128], index: 1, kind: input, shape index: {}]   ;;  %s1384_s0 = inlined_call_operand.vmem [shape: bf16[8,1152], index: 0, kind: input, shape index: {}]   ;;  %s1385_s2 = inlined_call_operand.vmem [shape: f32[1,128], index: 2, kind: input, shape index: {}]   ;;  %s1386_s3 = inlined_call_operand.vmem [shape: bf16[8,128], index: 3, kind: output, shape index: {}]  }
   0x1   :  { %v1043_v0 = vld [vmem:[%s1383_s1 + $0x78] sm:$0xff]   ;;  %v1047_v4 = vld [vmem:[%s1383_s1 + $0x70] sm:$0xff]   ;;  %v1051_v8 = vld [vmem:[%s1383_s1 + $0x68] sm:$0xff]  }
   0x2   :  { %v1044_v1 = vld [vmem:[%s1383_s1 + $0x38] sm:$0xff]   ;;  %924 = vmatprep.subr.bf16.mxu0 %v1043_v0  ;;  %v1048_v5 = vld [vmem:[%s1383_s1 + $0x30] sm:$0xff]   ;;  %v1052_v9 = vld [vmem:[%s1383_s1 + $0x28] sm:$0xff]  }
   0x3   :  { %v1045_v2 = vld [vmem:[%s1383_s1 + $0xf8] sm:$0xff]   ;;  %925 = vmatpush3.bf16.msra.mxu0 %v1044_v1  ;;  %v1049_v6 = vld [vmem:[%s1383_s1 + $0xf0] sm:$0xff]   ;;  %v1053_v10 = vld [vmem:[%s1383_s1 + $0xe8] sm:$0xff]  }
   0x4   :  { %v1046_v3 = vld [vmem:[%s1383_s1 + $0xb8] sm:$0xff]   ;;  %946 = vmatprep.subr.bf16.mxu1 %v1045_v2  ;;  %926 = vmatprep.subr.bf16.mxu0 %v1047_v4  ;;  %v1050_v7 = vld [vmem:[%s1383_s1 + $0xb0] sm:$0xff]   ;;  %v1054_v11 = vld [vmem:[%s1383_s1 + $0xa8] sm:$0xff]  }
   0x5   :  { %947 = vmatpush3.bf16.msra.mxu1 %v1046_v3  ;;  %v1055_v12 = vld [vmem:[%s1383_s1 + $0x60] sm:$0xff]   ;;  %v1059_v16 = vld [vmem:[%s1383_s1 + $0x58] sm:$0xff]   ;;  %v1063_v20 = vld [vmem:[%s1383_s1 + $0x50] sm:$0xff]  }
   0x6   :  { %948 = vmatprep.subr.bf16.mxu1 %v1049_v6  ;;  %v1056_v13 = vld [vmem:[%s1383_s1 + $0x20] sm:$0xff]   ;;  %v1060_v17 = vld [vmem:[%s1383_s1 + $0x18] sm:$0xff]   ;;  %v1064_v21 = vld [vmem:[%s1383_s1 + $0x10] sm:$0xff]  }
   0x7   :  { %927 = vmatpush3.bf16.msra.mxu0 %v1048_v5  ;;  %v1057_v14 = vld [vmem:[%s1383_s1 + $0xe0] sm:$0xff]   ;;  %v1061_v18 = vld [vmem:[%s1383_s1 + $0xd8] sm:$0xff]   ;;  %v1065_v22 = vld [vmem:[%s1383_s1 + $0xd0] sm:$0xff]  }
   0x8   :  { %928 = vmatprep.subr.bf16.mxu0 %v1051_v8  ;;  %v1058_v15 = vld [vmem:[%s1383_s1 + $0xa0] sm:$0xff]   ;;  %v1062_v19 = vld [vmem:[%s1383_s1 + $0x98] sm:$0xff]   ;;  %v1066_v23 = vld [vmem:[%s1383_s1 + $0x90] sm:$0xff]  }
   0x9   :  { %949 = vmatpush3.bf16.msra.mxu1 %v1050_v7  ;;  %v1067_v24 = vld [vmem:[%s1383_s1 + $0x48] sm:$0xff]   ;;  %v1071_v28 = vld [vmem:[%s1383_s1 + $0x40] sm:$0xff]   ;;  %v1077_v35 = vld [vmem:[%s1383_s1 + $0x178] sm:$0xff]  }
   0xa   :  { %950 = vmatprep.subr.bf16.mxu1 %v1053_v10  ;;  %v1068_v25 = vld [vmem:[%s1383_s1 + $0x8] sm:$0xff]   ;;  %v1072_v29 = vld [vmem:[%s1383_s1] sm:$0xff]   ;;  %v1080_v39 = vld [vmem:[%s1383_s1 + $0x138] sm:$0xff]  }
   0xb   :  { %929 = vmatpush3.bf16.msra.mxu0 %v1052_v9  ;;  %v1069_v26 = vld [vmem:[%s1383_s1 + $0xc8] sm:$0xff]   ;;  %v1073_v30 = vld [vmem:[%s1383_s1 + $0xc0] sm:$0xff]   ;;  %v1081_v40 = vld [vmem:[%s1383_s1 + $0x1f8] sm:$0xff]   ;;  %v1124_v9 = vmov 0.0  }
   0xc   :  { %930 = vmatprep.subr.bf16.mxu0 %v1055_v12  ;;  %v1070_v27 = vld [vmem:[%s1383_s1 + $0x88] sm:$0xff]   ;;  %v15_v31 = vld [vmem:[%s1384_s0] sm:$0xff]  ;;  %v1082_v41 = vld [vmem:[%s1383_s1 + $0x1b8] sm:$0xff]  }
   0xd   :  { %951 = vmatpush3.bf16.msra.mxu1 %v1054_v11  ;;  %v843_v32 = vcombine.low %v15_v31, %v15_v31  ;;  %v844_v33 = vcombine.high %v15_v31, %v15_v31  ;;  %v1076_v34 = vld [vmem:[%s1383_s1 + $0x80] sm:$0xff]   ;;  %v16_v36 = vld [vmem:[%s1384_s0 + $0x8] sm:$0xff]  ;;  %v1083_v42 = vld [vmem:[%s1383_s1 + $0x170] sm:$0xff]  }
   0xe   :  { %952 = vmatprep.subr.bf16.mxu1 %v1057_v14  ;;  %v845_v37 = vcombine.low %v16_v36, %v16_v36  ;;  %v846_v38 = vcombine.high %v16_v36, %v16_v36  ;;  %v1084_v43 = vld [vmem:[%s1383_s1 + $0x130] sm:$0xff]   ;;  %v1087_v46 = vld [vmem:[%s1383_s1 + $0x168] sm:$0xff]   ;;  %v1091_v50 = vld [vmem:[%s1383_s1 + $0x160] sm:$0xff]  }
   0xf   :  { %931 = vmatpush3.bf16.msra.mxu0 %v1056_v13  ;;  %667 = vmatprep.mubr.bf16.mxu0 %v844_v33  ;;  %v1085_v44 = vld [vmem:[%s1383_s1 + $0x1f0] sm:$0xff]   ;;  %v1088_v47 = vld [vmem:[%s1383_s1 + $0x128] sm:$0xff]   ;;  %v1092_v51 = vld [vmem:[%s1383_s1 + $0x120] sm:$0xff]  }
  0x10   :  { %932 = vmatprep.subr.bf16.mxu0 %v1059_v16  ;;  %707 = vmatprep.mubr.bf16.mxu1 %v846_v38  ;;  %v1086_v45 = vld [vmem:[%s1383_s1 + $0x1b0] sm:$0xff]   ;;  %v1089_v48 = vld [vmem:[%s1383_s1 + $0x1e8] sm:$0xff]   ;;  %v1093_v52 = vld [vmem:[%s1383_s1 + $0x1e0] sm:$0xff]  }
  0x11   :  { %953 = vmatpush3.bf16.msra.mxu1 %v1058_v15  ;;  %v1090_v49 = vld [vmem:[%s1383_s1 + $0x1a8] sm:$0xff]   ;;  %v1094_v53 = vld [vmem:[%s1383_s1 + $0x1a0] sm:$0xff]   ;;  %v1095_v54 = vld [vmem:[%s1383_s1 + $0x158] sm:$0xff]  }
  0x12   :  { %954 = vmatprep.subr.bf16.mxu1 %v1061_v18  ;;  %v1096_v55 = vld [vmem:[%s1383_s1 + $0x118] sm:$0xff]   ;;  %v1099_v58 = vld [vmem:[%s1383_s1 + $0x150] sm:$0xff]   ;;  %v1103_v62 = vld [vmem:[%s1383_s1 + $0x148] sm:$0xff]  }
  0x13   :  { %933 = vmatpush3.bf16.msra.mxu0 %v1060_v17  ;;  %v1097_v56 = vld [vmem:[%s1383_s1 + $0x1d8] sm:$0xff]   ;;  %v1100_v59 = vld [vmem:[%s1383_s1 + $0x110] sm:$0xff]   ;;  %v1104_v63 = vld [vmem:[%s1383_s1 + $0x108] sm:$0xff]  }
  0x14   :  { %934 = vmatprep.subr.bf16.mxu0 %v1063_v20  ;;  %v1098_v57 = vld [vmem:[%s1383_s1 + $0x198] sm:$0xff]   ;;  %v1101_v60 = vld [vmem:[%s1383_s1 + $0x1d0] sm:$0xff]   ;;  %v1105_v0 = vld [vmem:[%s1383_s1 + $0x1c8] sm:$0xff]  }
  0x15   :  { %955 = vmatpush3.bf16.msra.mxu1 %v1062_v19  ;;  %v1102_v61 = vld [vmem:[%s1383_s1 + $0x190] sm:$0xff]   ;;  %v1106_v1 = vld [vmem:[%s1383_s1 + $0x188] sm:$0xff]   ;;  %v1107_v2 = vld [vmem:[%s1383_s1 + $0x140] sm:$0xff]  }
  0x16   :  { %956 = vmatprep.subr.bf16.mxu1 %v1065_v22  ;;  %v1108_v3 = vld [vmem:[%s1383_s1 + $0x100] sm:$0xff]   ;;  %v17_v5 = vld [vmem:[%s1384_s0 + $0x10] sm:$0xff]  ;;  %v18_v10 = vld [vmem:[%s1384_s0 + $0x18] sm:$0xff] }
  0x17   :  { %935 = vmatpush3.bf16.msra.mxu0 %v1064_v21  ;;  %v1109_v4 = vld [vmem:[%s1383_s1 + $0x1c0] sm:$0xff]   ;;  %v847_v6 = vcombine.low %v17_v5, %v17_v5  ;;  %v848_v7 = vcombine.high %v17_v5, %v17_v5  ;;  %v849_v11 = vcombine.low %v18_v10, %v18_v10  ;;  %v850_v12 = vcombine.high %v18_v10, %v18_v10  ;;  %v1115_v13 = vld [vmem:[%s1383_s1 + $0x238] sm:$0xff]   ;;  %v1116_v14 = vld [vmem:[%s1383_s1 + $0x230] sm:$0xff]  }
  0x18   :  { %936 = vmatprep.subr.bf16.mxu0 %v1067_v24  ;;  %v1112_v8 = vld [vmem:[%s1383_s1 + $0x180] sm:$0xff]   ;;  %v1117_v15 = vld [vmem:[%s1383_s1 + $0x228] sm:$0xff]   ;;  %v1119_v17 = vld [vmem:[%s1383_s1 + $0x218] sm:$0xff]  }
  0x19   :  { %957 = vmatpush3.bf16.msra.mxu1 %v1066_v23  ;;  %v1118_v16 = vld [vmem:[%s1383_s1 + $0x220] sm:$0xff]   ;;  %v1120_v18 = vld [vmem:[%s1383_s1 + $0x210] sm:$0xff]   ;;  %v1121_v19 = vld [vmem:[%s1383_s1 + $0x208] sm:$0xff]  }
  0x1a   :  { %958 = vmatprep.subr.bf16.mxu1 %v1069_v26  ;;  %v1122_v20 = vld [vmem:[%s1383_s1 + $0x200] sm:$0xff]  }
  0x1b   :  { %937 = vmatpush3.bf16.msra.mxu0 %v1068_v25  ;;  %v1123_v21 = vld [vmem:[%s1384_s0 + $0x20] ss:$0 sps:$4 sm:$0xff]  }
  0x1c   :  { %938 = vmatprep.subr.bf16.mxu0 %v1071_v28 }
  0x1d   :  { %959 = vmatpush3.bf16.msra.mxu1 %v1070_v27 }
  0x1e   :  { %960 = vmatprep.subr.bf16.mxu1 %v1073_v30 }
  0x1f   :  { %939 = vmatpush3.bf16.msra.mxu0 %v1072_v29 }
  0x20   :  { %968 = vmatprep.subr.bf16.mxu0 %v1077_v35 }
  0x21   :  { %961 = vmatpush3.bf16.msra.mxu1 %v1076_v34 }
  0x22   :  { %668 = vmatmul.mubr.bf16.vlgmr.msra.gmra.mxu0 %v843_v32  ;;  %990 = vmatprep.subr.bf16.mxu1 %v1081_v40 }
  0x23   :  { %969 = vmatpush3.bf16.msra.mxu0 %v1080_v39  ;;  %747 = vmatprep.mubr.bf16.mxu0 %v848_v7  ;;  %v842_v39 = vld [vmem:[%s1385_s2] ss:$0 sm:$0xff] }
  0x24   :  { %708 = vmatmul.mubr.bf16.vlgmr.msra.gmra.mxu1 %v845_v37  ;;  %970 = vmatprep.subr.bf16.mxu0 %v1083_v42 }
  0x25   :  { %991 = vmatpush3.bf16.msra.mxu1 %v1082_v41  ;;  %787 = vmatprep.mubr.bf16.mxu1 %v850_v12 }
  0x26   :  { %992 = vmatprep.subr.bf16.mxu1 %v1085_v44 }
  0x27   :  { %971 = vmatpush3.bf16.msra.mxu0 %v1084_v43 }
  0x28   :  { %972 = vmatprep.subr.bf16.mxu0 %v1087_v46 }
  0x29   :  { %993 = vmatpush3.bf16.msra.mxu1 %v1086_v45 }
  0x2a   :  { %994 = vmatprep.subr.bf16.mxu1 %v1089_v48 }
  0x2b   :  { %973 = vmatpush3.bf16.msra.mxu0 %v1088_v47 }
  0x2c   :  { %974 = vmatprep.subr.bf16.mxu0 %v1091_v50 }
  0x2d   :  { %995 = vmatpush3.bf16.msra.mxu1 %v1090_v49 }
  0x2e   :  { %996 = vmatprep.subr.bf16.mxu1 %v1093_v52 }
  0x2f   :  { %975 = vmatpush3.bf16.msra.mxu0 %v1092_v51 }
  0x30   :  { %976 = vmatprep.subr.bf16.mxu0 %v1095_v54 }
  0x31   :  { %997 = vmatpush3.bf16.msra.mxu1 %v1094_v53 }
  0x32   :  { %998 = vmatprep.subr.bf16.mxu1 %v1097_v56 }
  0x33   :  { %977 = vmatpush3.bf16.msra.mxu0 %v1096_v55 }
  0x34   :  { %978 = vmatprep.subr.bf16.mxu0 %v1099_v58 }
  0x35   :  { %999 = vmatpush3.bf16.msra.mxu1 %v1098_v57 }
  0x36   :  { %1000 = vmatprep.subr.bf16.mxu1 %v1101_v60 }
  0x37   :  { %979 = vmatpush3.bf16.msra.mxu0 %v1100_v59 }
  0x38   :  { %980 = vmatprep.subr.bf16.mxu0 %v1103_v62 }
  0x39   :  { %1001 = vmatpush3.bf16.msra.mxu1 %v1102_v61 }
  0x3a   :  { %1002 = vmatprep.subr.bf16.mxu1 %v1105_v0 }
  0x3b   :  { %981 = vmatpush3.bf16.msra.mxu0 %v1104_v63 }
  0x3c   :  { %982 = vmatprep.subr.bf16.mxu0 %v1107_v2 }
  0x3d   :  { %1003 = vmatpush3.bf16.msra.mxu1 %v1106_v1 }
  0x3e   :  { %1004 = vmatprep.subr.bf16.mxu1 %v1109_v4 }
  0x3f   :  { %983 = vmatpush3.bf16.msra.mxu0 %v1108_v3 }
  0x40   :  { %1021 = vmatprep.subr.bf16.mxu0 %v1124_v9 }
  0x41   :  { %1005 = vmatpush3.bf16.msra.mxu1 %v1112_v8 }
  0x42   :  { %748 = vmatmul.mubr.bf16.vlgmr.msra.gmra.mxu0 %v847_v6 }
  0x43   :  { %1022 = vmatpush3.bf16.msra.mxu0 %v1115_v13  ;;  %1037 = vmatprep.mubr.msk.bf16.mxu0 %vm1125_vm0, %v1124_v9 }
  0x44   :  { %788 = vmatmul.mubr.bf16.vlgmr.msra.gmra.mxu1 %v849_v11  ;;  %1023 = vmatprep.subr.bf16.mxu0 %v1124_v9 }
  0x47   :  { %1024 = vmatpush3.bf16.msra.mxu0 %v1116_v14 }
  0x48   :  { %1025 = vmatprep.subr.bf16.mxu0 %v1124_v9 }
  0x4b   :  { %1026 = vmatpush3.bf16.msra.mxu0 %v1117_v15 }
  0x4c   :  { %1027 = vmatprep.subr.bf16.mxu0 %v1124_v9 }
  0x4f   :  { %1028 = vmatpush3.bf16.msra.mxu0 %v1118_v16 }
  0x50   :  { %1029 = vmatprep.subr.bf16.mxu0 %v1124_v9 }
  0x53   :  { %1030 = vmatpush3.bf16.msra.mxu0 %v1119_v17 }
  0x54   :  { %1031 = vmatprep.subr.bf16.mxu0 %v1124_v9 }
  0x57   :  { %1032 = vmatpush3.bf16.msra.mxu0 %v1120_v18 }
  0x58   :  { %1033 = vmatprep.subr.bf16.mxu0 %v1124_v9 }
  0x5b   :  { %1034 = vmatpush3.bf16.msra.mxu0 %v1121_v19 }
  0x5c   :  { %1035 = vmatprep.subr.bf16.mxu0 %v1124_v9 }
  0x5f   :  { %1036 = vmatpush3.bf16.msra.mxu0 %v1122_v20 }
  0x62   :  { %1038 = vmatmul.mubr.bf16.vlgmr.msra.gmra.mxu0 %v1123_v21 }
  0xe2   :  { %v940_v22 = vpop.f32.mrf.mxu0 }
  0xe4   :  { %v941_v23 = vpop.f32.mrf.mxu0  ;;  %v962_v24 = vpop.f32.mrf.mxu1 }
  0xe5   :  { %v942_v38 = vadd.f32 %v941_v23, %v940_v22 }
  0xe6   :  { %v943_v25 = vpop.f32.mrf.mxu0  ;;  %v963_v26 = vpop.f32.mrf.mxu1 }
  0xe7   :  { %v670_v40 = vadd.f32 %v942_v38, %v842_v39  ;;  %v964_v41 = vadd.f32 %v963_v26, %v962_v24 }
  0xe8   :  { %v944_v27 = vpop.f32.mrf.mxu0  ;;  %v965_v28 = vpop.f32.mrf.mxu1 }
  0xe9   :  { %v710_v43 = vadd.f32 %v964_v41, %v670_v40 }
  0xea   :  { %v966_v29 = vpop.f32.mrf.mxu1 }
 0x102   :  { %v984_v30 = vpop.f32.mrf.mxu0 }
 0x104   :  { %v985_v31 = vpop.f32.mrf.mxu0  ;;  %v1006_v32 = vpop.f32.mrf.mxu1 }
 0x105   :  { %v986_v42 = vadd.f32 %v985_v31, %v984_v30 }
 0x106   :  { %v987_v33 = vpop.f32.mrf.mxu0  ;;  %v1007_v34 = vpop.f32.mrf.mxu1 }
 0x107   :  { %v750_v44 = vadd.f32 %v986_v42, %v710_v43  ;;  %v1008_v45 = vadd.f32 %v1007_v34, %v1006_v32 }
 0x108   :  { %v988_v35 = vpop.f32.mrf.mxu0  ;;  %v1009_v36 = vpop.f32.mrf.mxu1 }
 0x109   :  { %v790_v46 = vadd.f32 %v1008_v45, %v750_v44 }
 0x10a   :  { %v1010_v37 = vpop.f32.mrf.mxu1 }
 0x122   :  { %v829_v47 = vpop.f32.mrf.mxu0 }
 0x123   :  { %v830_v48 = vadd.f32 %v829_v47, %v790_v46 }
 0x124   :  { %v1039_v49 = vpop.f32.mrf.mxu0 }
 0x125   :  { %v835_v50 = vmax.f32 %v830_v48, 0.0 }
 0x126   :  { %v832_v51 = vpop.f32.mrf.mxu0 }
 0x127   :  { %v836_v52 = vpack.c.bf16 %v835_v50, %v835_v50 }
 0x128   :  { %v1040_v53 = vpop.f32.mrf.mxu0 }
 0x129   :  { %837 = vst [vmem:[%s1386_s3] sm:$0xf] %v836_v52 }

// kernel: tinycar_combo_forward.11
= control target key start
LH: loop header
LB: loop body
LE: loop exit
PB: predicated region body
PF: predicated region fallthrough
CT: control target
= control target key end

     0   :  { %v1172_v1 = vmov 0   ;;  %v1173_v51 = vmov 0.0   ;;  %v67_v57 = vlaneseq  ;;  %vm1174_vm0 = vmmov 0   ;;  %s1523_s4 = inlined_call_operand.vmem [shape: bf16[128,256], index: 4, kind: input, shape index: {}]   ;;  %s1524_s2 = inlined_call_operand.vmem [shape: bf16[128,256], index: 2, kind: input, shape index: {}]   ;;  %s1525_s1 = inlined_call_operand.vmem [shape: bf16[8,128], index: 1, kind: input, shape index: {}]   ;;  %s1526_s0 = inlined_call_operand.vmem [shape: bf16[8,128], index: 0, kind: input, shape index: {}]   ;;  %s1527_s6 = inlined_call_operand.vmem [shape: bf16[256,128], index: 6, kind: input, shape index: {}]   ;;  %s1528_s8 = inlined_call_operand.vmem [shape: bf16[128,128], index: 8, kind: input, shape index: {}]   ;;  %s1529_s5 = inlined_call_operand.vmem [shape: f32[1,256], index: 5, kind: input, shape index: {}]   ;;  %s1530_s3 = inlined_call_operand.vmem [shape: f32[1,256], index: 3, kind: input, shape index: {}]   ;;  %s1531_s10 = inlined_call_operand.vmem [shape: bf16[128,128], index: 10, kind: input, shape index: {}]   ;;  %s1532_s7 = inlined_call_operand.vmem [shape: f32[1,128], index: 7, kind: input, shape index: {}]   ;;  %s1533_s12 = inlined_call_operand.vmem [shape: bf16[128,128], index: 12, kind: input, shape index: {}]   ;;  %s1534_s9 = inlined_call_operand.vmem [shape: f32[1,128], index: 9, kind: input, shape index: {}]   ;;  %s1535_s11 = inlined_call_operand.vmem [shape: f32[1,128], index: 11, kind: input, shape index: {}]   ;;  %s1536_s13 = inlined_call_operand.vmem [shape: f32[1,128], index: 13, kind: input, shape index: {}]   ;;  %s1537_s14 = inlined_call_operand.vmem [shape: f32[8,128], index: 14, kind: output, shape index: {}]  }
   0x1   :  { %v1074_v0 = vld [vmem:[%s1523_s4 + $0x74] ss:$8 sps:$4 sm:$0xff]   ;;  %341 = vmatprep.mubr.bf16.mxu1 %v1172_v1  ;;  %189 = vmatprep.mubr.bf16.mxu0 %v1172_v1  ;;  %v1076_v2 = vld [vmem:[%s1523_s4 + $0x70] ss:$8 sps:$4 sm:$0xff]   ;;  %v1077_v3 = vld [vmem:[%s1523_s4 + $0x64] ss:$8 sps:$4 sm:$0xff]  }
   0x2   :  { %309 = vmatprep.subr.bf16.mxu1 %v1074_v0  ;;  %v1079_v4 = vld [vmem:[%s1523_s4 + $0x60] ss:$8 sps:$4 sm:$0xff]   ;;  %v1080_v5 = vld [vmem:[%s1523_s4 + $0x54] ss:$8 sps:$4 sm:$0xff]   ;;  %v1082_v6 = vld [vmem:[%s1523_s4 + $0x50] ss:$8 sps:$4 sm:$0xff]  }
   0x3   :  { %310 = vmatpush1.bf16.msra.mxu1 %v1076_v2  ;;  %v1083_v7 = vld [vmem:[%s1523_s4 + $0x44] ss:$8 sps:$4 sm:$0xff]   ;;  %v1095_v8 = vld [vmem:[%s1524_s2 + $0x74] ss:$8 sps:$4 sm:$0xff]   ;;  %v1097_v9 = vld [vmem:[%s1524_s2 + $0x70] ss:$8 sps:$4 sm:$0xff]  }
   0x4   :  { %311 = vmatprep.subr.bf16.mxu1 %v1077_v3  ;;  %v1085_v10 = vld [vmem:[%s1523_s4 + $0x40] ss:$8 sps:$4 sm:$0xff]   ;;  %v1086_v11 = vld [vmem:[%s1523_s4 + $0x34] ss:$8 sps:$4 sm:$0xff]   ;;  %157 = vmatprep.subr.bf16.mxu0 %v1095_v8  ;;  %v1101_v12 = vld [vmem:[%s1524_s2 + $0x64] ss:$8 sps:$4 sm:$0xff]  }
   0x5   :  { %158 = vmatpush1.bf16.msra.mxu0 %v1097_v9  ;;  %v1103_v13 = vld [vmem:[%s1524_s2 + $0x60] ss:$8 sps:$4 sm:$0xff]   ;;  %v1104_v14 = vld [vmem:[%s1524_s2 + $0x54] ss:$8 sps:$4 sm:$0xff]   ;;  %v1088_v15 = vld [vmem:[%s1523_s4 + $0x30] ss:$8 sps:$4 sm:$0xff]  }
   0x6   :  { %159 = vmatprep.subr.bf16.mxu0 %v1101_v12  ;;  %v1089_v16 = vld [vmem:[%s1523_s4 + $0x24] ss:$8 sps:$4 sm:$0xff]   ;;  %v1106_v17 = vld [vmem:[%s1524_s2 + $0x50] ss:$8 sps:$4 sm:$0xff]   ;;  %v1091_v19 = vld [vmem:[%s1523_s4 + $0x20] ss:$8 sps:$4 sm:$0xff]  }
   0x7   :  { %312 = vmatpush1.bf16.msra.mxu1 %v1079_v4  ;;  %v1107_v18 = vld [vmem:[%s1524_s2 + $0x44] ss:$8 sps:$4 sm:$0xff]   ;;  %v1092_v20 = vld [vmem:[%s1523_s4 + $0x14] ss:$8 sps:$4 sm:$0xff]   ;;  %v1109_v21 = vld [vmem:[%s1524_s2 + $0x40] ss:$8 sps:$4 sm:$0xff]  }
   0x8   :  { %313 = vmatprep.subr.bf16.mxu1 %v1080_v5  ;;  %v1110_v22 = vld [vmem:[%s1524_s2 + $0x34] ss:$8 sps:$4 sm:$0xff]   ;;  %v1094_v23 = vld [vmem:[%s1523_s4 + $0x10] ss:$8 sps:$4 sm:$0xff]   ;;  %v1098_v24 = vld [vmem:[%s1523_s4 + $0x4] ss:$8 sps:$4 sm:$0xff]  }
   0x9   :  { %160 = vmatpush1.bf16.msra.mxu0 %v1103_v13  ;;  %v1112_v25 = vld [vmem:[%s1524_s2 + $0x30] ss:$8 sps:$4 sm:$0xff]   ;;  %v1113_v26 = vld [vmem:[%s1524_s2 + $0x24] ss:$8 sps:$4 sm:$0xff]   ;;  %v1100_v27 = vld [vmem:[%s1523_s4] ss:$8 sps:$4 sm:$0xff]  }
   0xa   :  { %161 = vmatprep.subr.bf16.mxu0 %v1104_v14  ;;  %v1115_v28 = vld [vmem:[%s1524_s2 + $0x20] ss:$8 sps:$4 sm:$0xff]   ;;  %v1116_v29 = vld [vmem:[%s1524_s2 + $0x14] ss:$8 sps:$4 sm:$0xff]   ;;  %v1118_v31 = vld [vmem:[%s1524_s2 + $0x10] ss:$8 sps:$4 sm:$0xff]  }
   0xb   :  { %314 = vmatpush1.bf16.msra.mxu1 %v1082_v6  ;;  %v200_v30 = vld [vmem:[%s1525_s1] sm:$0xf]  ;;  %v1119_v32 = vld [vmem:[%s1524_s2 + $0x4] ss:$8 sps:$4 sm:$0xff]   ;;  %v1122_v35 = vld [vmem:[%s1527_s6 + $0x78] sm:$0xff]   ;;  %v68_v58 = vshrl.u32 %v67_v57, 7 }
   0xc   :  { %315 = vmatprep.subr.bf16.mxu1 %v1083_v7  ;;  %v1121_v33 = vld [vmem:[%s1524_s2] ss:$8 sps:$4 sm:$0xff]   ;;  %v1123_v36 = vld [vmem:[%s1527_s6 + $0x38] sm:$0xff]   ;;  %v1124_v37 = vld [vmem:[%s1527_s6 + $0x70] sm:$0xff]  }
   0xd   :  { %162 = vmatpush1.bf16.msra.mxu0 %v1106_v17  ;;  %v48_v34 = vld [vmem:[%s1526_s0] sm:$0xf]  ;;  %v1125_v38 = vld [vmem:[%s1527_s6 + $0x30] sm:$0xff]   ;;  %v1126_v39 = vld [vmem:[%s1527_s6 + $0x68] sm:$0xff]   ;;  %v69_v59 = vsub.s32 0, %v68_v58  ;;  %v73_v61 = vsub.s32 1, %v68_v58 }
   0xe   :  { %163 = vmatprep.subr.bf16.mxu0 %v1107_v18  ;;  %v1127_v40 = vld [vmem:[%s1527_s6 + $0x28] sm:$0xff]   ;;  %v1128_v41 = vld [vmem:[%s1527_s6 + $0x60] sm:$0xff]   ;;  %v1130_v43 = vld [vmem:[%s1527_s6 + $0x58] sm:$0xff]  }
   0xf   :  { %316 = vmatpush1.bf16.msra.mxu1 %v1085_v10  ;;  %v1129_v42 = vld [vmem:[%s1527_s6 + $0x20] sm:$0xff]   ;;  %v1131_v44 = vld [vmem:[%s1527_s6 + $0x18] sm:$0xff]   ;;  %v1132_v45 = vld [vmem:[%s1527_s6 + $0x50] sm:$0xff]  }
  0x10   :  { %317 = vmatprep.subr.bf16.mxu1 %v1086_v11  ;;  %v1133_v46 = vld [vmem:[%s1527_s6 + $0x10] sm:$0xff]   ;;  %v1134_v47 = vld [vmem:[%s1527_s6 + $0x48] sm:$0xff]   ;;  %v1136_v49 = vld [vmem:[%s1527_s6 + $0x40] sm:$0xff]  }
  0x11   :  { %164 = vmatpush1.bf16.msra.mxu0 %v1109_v21  ;;  %v1135_v48 = vld [vmem:[%s1527_s6 + $0x8] sm:$0xff]   ;;  %v1137_v50 = vld [vmem:[%s1527_s6] sm:$0xff]   ;;  %v1138_v52 = vld [vmem:[%s1528_s8 + $0x38] sm:$0xff]  }
  0x12   :  { %165 = vmatprep.subr.bf16.mxu0 %v1110_v22  ;;  %v1139_v53 = vld [vmem:[%s1528_s8 + $0x30] sm:$0xff]   ;;  %v1140_v54 = vld [vmem:[%s1528_s8 + $0x28] sm:$0xff]   ;;  %v1141_v55 = vld [vmem:[%s1528_s8 + $0x20] sm:$0xff]  }
  0x13   :  { %318 = vmatpush1.bf16.msra.mxu1 %v1088_v15  ;;  %v1142_v56 = vld [vmem:[%s1528_s8 + $0x18] sm:$0xff]   ;;  %v217_v60 = vld [vmem:[%s1529_s5] sm:$0x3]  ;;  %v1159_v57 = vld [vmem:[%s1533_s12 + $0x10] sm:$0xff]  }
  0x14   :  { %319 = vmatprep.subr.bf16.mxu1 %v1089_v16  ;;  %v222_v62 = vrot.slane %v217_v60, %v69_v59  ;;  %v226_v63 = vrot.slane %v217_v60, %v73_v61  ;;  %v65_v18 = vld [vmem:[%s1530_s3] sm:$0x3] }
  0x15   :  { %166 = vmatpush1.bf16.msra.mxu0 %v1112_v25  ;;  %v935_v58 = vld [vmem:[%s1534_s9] ss:$0 sm:$0xff] }
  0x16   :  { %167 = vmatprep.subr.bf16.mxu0 %v1113_v26 }
  0x17   :  { %320 = vmatpush1.bf16.msra.mxu1 %v1091_v19  ;;  %v70_v19 = vrot.slane %v65_v18, %v69_v59 }
  0x18   :  { %321 = vmatprep.subr.bf16.mxu1 %v1092_v20  ;;  %v74_v20 = vrot.slane %v65_v18, %v73_v61 }
  0x19   :  { %168 = vmatpush1.bf16.msra.mxu0 %v1115_v28 }
  0x1a   :  { %169 = vmatprep.subr.bf16.mxu0 %v1116_v29 }
  0x1b   :  { %322 = vmatpush1.bf16.msra.mxu1 %v1094_v23 }
  0x1c   :  { %323 = vmatprep.subr.bf16.mxu1 %v1098_v24 }
  0x1d   :  { %170 = vmatpush1.bf16.msra.mxu0 %v1118_v31  ;;  %v1143_v31 = vld [vmem:[%s1528_s8 + $0x10] sm:$0xff]  }
  0x1e   :  { %171 = vmatprep.subr.bf16.mxu0 %v1119_v32  ;;  %v1144_v32 = vld [vmem:[%s1528_s8 + $0x8] sm:$0xff]  }
  0x1f   :  { %324 = vmatpush1.bf16.msra.mxu1 %v1100_v27 }
  0x20   :  { %1011 = vmatprep.subr.bf16.mxu1 %v1173_v51 }
  0x21   :  { %172 = vmatpush1.bf16.msra.mxu0 %v1121_v33  ;;  %v1145_v33 = vld [vmem:[%s1528_s8] sm:$0xff]  }
  0x22   :  { %342 = vmatmul.mubr.bf16.vlgmr.msra.gmra.mxu1 %v200_v30  ;;  %962 = vmatprep.subr.bf16.mxu0 %v1122_v35  ;;  %v1147_v35 = vld [vmem:[%s1531_s10 + $0x30] sm:$0xff]  }
  0x23   :  { %1012 = vmatpush3.bf16.msra.mxu1 %v1138_v52  ;;  %1027 = vmatprep.mubr.msk.bf16.mxu1 %vm1174_vm0, %v1173_v51  ;;  %v1154_v52 = vld [vmem:[%s1533_s12 + $0x38] sm:$0xff]  }
  0x24   :  { %190 = vmatmul.mubr.bf16.vlgmr.msra.gmra.mxu0 %v48_v34  ;;  %1013 = vmatprep.subr.bf16.mxu1 %v1173_v51  ;;  %v1146_v34 = vld [vmem:[%s1531_s10 + $0x38] sm:$0xff]  }
  0x25   :  { %963 = vmatpush3.bf16.msra.mxu0 %v1123_v36  ;;  %v1148_v36 = vld [vmem:[%s1531_s10 + $0x28] sm:$0xff]  }
  0x26   :  { %964 = vmatprep.subr.bf16.mxu0 %v1124_v37  ;;  %v1149_v37 = vld [vmem:[%s1531_s10 + $0x20] sm:$0xff]  }
  0x27   :  { %1014 = vmatpush3.bf16.msra.mxu1 %v1139_v53  ;;  %v1155_v53 = vld [vmem:[%s1533_s12 + $0x30] sm:$0xff]  }
  0x28   :  { %1015 = vmatprep.subr.bf16.mxu1 %v1173_v51 }
  0x29   :  { %965 = vmatpush3.bf16.msra.mxu0 %v1125_v38  ;;  %v1150_v38 = vld [vmem:[%s1531_s10 + $0x18] sm:$0xff]  }
  0x2a   :  { %966 = vmatprep.subr.bf16.mxu0 %v1126_v39  ;;  %v1151_v39 = vld [vmem:[%s1531_s10 + $0x10] sm:$0xff]  }
  0x2b   :  { %1016 = vmatpush3.bf16.msra.mxu1 %v1140_v54  ;;  %v1156_v54 = vld [vmem:[%s1533_s12 + $0x28] sm:$0xff]  }
  0x2c   :  { %1017 = vmatprep.subr.bf16.mxu1 %v1173_v51 }
  0x2d   :  { %967 = vmatpush3.bf16.msra.mxu0 %v1127_v40 }
  0x2e   :  { %968 = vmatprep.subr.bf16.mxu0 %v1128_v41  ;;  %v918_v41 = vld [vmem:[%s1532_s7] ss:$0 sm:$0xff] }
  0x2f   :  { %1018 = vmatpush3.bf16.msra.mxu1 %v1141_v55  ;;  %v1157_v55 = vld [vmem:[%s1533_s12 + $0x20] sm:$0xff]  }
  0x30   :  { %1019 = vmatprep.subr.bf16.mxu1 %v1173_v51 }
  0x31   :  { %969 = vmatpush3.bf16.msra.mxu0 %v1129_v42 }
  0x32   :  { %970 = vmatprep.subr.bf16.mxu0 %v1130_v43 }
  0x33   :  { %1020 = vmatpush3.bf16.msra.mxu1 %v1142_v56  ;;  %v1158_v56 = vld [vmem:[%s1533_s12 + $0x18] sm:$0xff]  }
  0x34   :  { %1021 = vmatprep.subr.bf16.mxu1 %v1173_v51 }
  0x35   :  { %971 = vmatpush3.bf16.msra.mxu0 %v1131_v44 }
  0x36   :  { %972 = vmatprep.subr.bf16.mxu0 %v1132_v45 }
  0x37   :  { %1022 = vmatpush3.bf16.msra.mxu1 %v1143_v31 }
  0x38   :  { %1023 = vmatprep.subr.bf16.mxu1 %v1173_v51 }
  0x39   :  { %973 = vmatpush3.bf16.msra.mxu0 %v1133_v46 }
  0x3a   :  { %974 = vmatprep.subr.bf16.mxu0 %v1134_v47 }
  0x3b   :  { %1024 = vmatpush3.bf16.msra.mxu1 %v1144_v32 }
  0x3c   :  { %1025 = vmatprep.subr.bf16.mxu1 %v1173_v51 }
  0x3d   :  { %975 = vmatpush3.bf16.msra.mxu0 %v1135_v48 }
  0x3e   :  { %976 = vmatprep.subr.bf16.mxu0 %v1136_v49  ;;  %v1152_v49 = vld [vmem:[%s1531_s10 + $0x8] sm:$0xff]  }
  0x3f   :  { %1026 = vmatpush3.bf16.msra.mxu1 %v1145_v33 }
  0x40   :  { %1051 = vmatprep.subr.bf16.mxu1 %v1173_v51 }
  0x41   :  { %977 = vmatpush3.bf16.msra.mxu0 %v1137_v50  ;;  %v1153_v50 = vld [vmem:[%s1531_s10] sm:$0xff]  }
  0x42   :  { %1031 = vmatprep.subr.bf16.mxu0 %v1173_v51 }
  0xe2   :  { %v343_v0 = vpop.f32.mrf.mxu1 }
  0xe3   :  { %v344_v1 = vadd.f32 %v343_v0, %v222_v62 }
  0xe4   :  { %v345_v2 = vpop.f32.mrf.mxu1  ;;  %v191_v10 = vpop.f32.mrf.mxu0 }
  0xe5   :  { %v350_v3 = vsub.f32 0.0, %v344_v1  ;;  %v346_v4 = vadd.f32 %v345_v2, %v226_v63  ;;  %v192_v21 = vadd.f32 %v191_v10, %v70_v19  ;;  %v1160_v2 = vld [vmem:[%s1533_s12 + $0x8] sm:$0xff]  }
  0xe6   :  { %v347_v5 = vpop.f32.mrf.mxu1  ;;  %v193_v11 = vpop.f32.mrf.mxu0 }
  0xe7   :  { %v352_v6 = vmul.f32 1.442695, %v350_v3  ;;  %v351_v7 = vsub.f32 0.0, %v346_v4  ;;  %v194_v22 = vadd.f32 %v193_v11, %v74_v20  ;;  %v198_v23 = vmax.f32 %v192_v21, 0.0  ;;  %v1161_v3 = vld [vmem:[%s1533_s12] sm:$0xff]  }
  0xe8   :  { %v348_v8 = vpop.f32.mrf.mxu1  ;;  %v195_v12 = vpop.f32.mrf.mxu0  ;;  %v944_v4 = vld [vmem:[%s1535_s11] ss:$0 sm:$0xff] }
  0xe9   :  { %1162 = vpow2.f32 %v352_v6  ;;  %v354_v9 = vmul.f32 1.442695, %v351_v7  ;;  %v199_v25 = vmax.f32 %v194_v22, 0.0 }
  0xea   :  { %v196_v13 = vpop.f32.mrf.mxu0 }
  0xeb   :  { %1164 = vpow2.f32 %v354_v9 }
  0xf6   :  { %v1163_v14 = vpop.eup %1162 }
  0xf7   :  { %v356_v15 = vadd.f32 1.0, %v1163_v14 }
  0xf8   :  { %v1165_v16 = vpop.eup %1164 }
  0xf9   :  { %1166 = vrcp.f32 %v356_v15  ;;  %v357_v17 = vadd.f32 1.0, %v1165_v16 }
  0xfb   :  { %1168 = vrcp.f32 %v357_v17 }
 0x106   :  { %v1167_v24 = vpop.eup %1166 }
 0x107   :  { %v362_v27 = vmul.f32 %v1167_v24, %v198_v23 }
 0x108   :  { %v1169_v26 = vpop.eup %1168 }
 0x109   :  { %v363_v28 = vmul.f32 %v1169_v26, %v199_v25  ;;  %v364_v30 = vpack.c.bf16 %v362_v27, %v362_v27 }
 0x10b   :  { %v365_v29 = vpack.c.bf16 %v363_v28, %v363_v28 }
 0x10d   :  { %533 = vmatprep.mubr.bf16.mxu0 %v365_v29 }
 0x10e   :  { %534 = vmatmul.mubr.bf16.vlgmr.msra.gmra.mxu0 %v364_v30 }
 0x10f   :  { %1047 = vmatprep.mubr.msk.bf16.mxu0 %vm1174_vm0, %v1173_v51  ;;  %1032 = vmatpush3.bf16.msra.mxu0 %v1146_v34 }
 0x110   :  { %1033 = vmatprep.subr.bf16.mxu0 %v1173_v51 }
 0x113   :  { %1034 = vmatpush3.bf16.msra.mxu0 %v1147_v35 }
 0x114   :  { %1035 = vmatprep.subr.bf16.mxu0 %v1173_v51 }
 0x117   :  { %1036 = vmatpush3.bf16.msra.mxu0 %v1148_v36 }
 0x118   :  { %1037 = vmatprep.subr.bf16.mxu0 %v1173_v51 }
 0x11b   :  { %1038 = vmatpush3.bf16.msra.mxu0 %v1149_v37 }
 0x11c   :  { %1039 = vmatprep.subr.bf16.mxu0 %v1173_v51 }
 0x11f   :  { %1040 = vmatpush3.bf16.msra.mxu0 %v1150_v38 }
 0x120   :  { %1041 = vmatprep.subr.bf16.mxu0 %v1173_v51 }
 0x123   :  { %1042 = vmatpush3.bf16.msra.mxu0 %v1151_v39 }
 0x124   :  { %1043 = vmatprep.subr.bf16.mxu0 %v1173_v51 }
 0x127   :  { %1044 = vmatpush3.bf16.msra.mxu0 %v1152_v49 }
 0x128   :  { %1045 = vmatprep.subr.bf16.mxu0 %v1173_v51 }
 0x12b   :  { %1046 = vmatpush3.bf16.msra.mxu0 %v1153_v50 }
 0x1ce   :  { %v978_v40 = vpop.f32.mrf.mxu0 }
 0x1d0   :  { %v979_v42 = vpop.f32.mrf.mxu0 }
 0x1d1   :  { %v980_v43 = vadd.f32 %v979_v42, %v978_v40 }
 0x1d2   :  { %v981_v44 = vpop.f32.mrf.mxu0 }
 0x1d3   :  { %v536_v45 = vadd.f32 %v980_v43, %v918_v41 }
 0x1d4   :  { %v982_v46 = vpop.f32.mrf.mxu0 }
 0x1d5   :  { %v541_v47 = vmax.f32 %v536_v45, 0.0 }
 0x1d7   :  { %v542_v48 = vpack.c.bf16 %v541_v47, %v541_v47 }
 0x1d9   :  { %1028 = vmatmul.mubr.bf16.vlgmr.msra.gmra.mxu1 %v542_v48 }
 0x1da   :  { %1067 = vmatprep.mubr.msk.bf16.mxu1 %vm1174_vm0, %v1173_v51  ;;  %1052 = vmatpush3.bf16.msra.mxu1 %v1154_v52 }
 0x1db   :  { %1053 = vmatprep.subr.bf16.mxu1 %v1173_v51 }
 0x1de   :  { %1054 = vmatpush3.bf16.msra.mxu1 %v1155_v53 }
 0x1df   :  { %1055 = vmatprep.subr.bf16.mxu1 %v1173_v51 }
 0x1e2   :  { %1056 = vmatpush3.bf16.msra.mxu1 %v1156_v54 }
 0x1e3   :  { %1057 = vmatprep.subr.bf16.mxu1 %v1173_v51 }
 0x1e6   :  { %1058 = vmatpush3.bf16.msra.mxu1 %v1157_v55 }
 0x1e7   :  { %1059 = vmatprep.subr.bf16.mxu1 %v1173_v51 }
 0x1ea   :  { %1060 = vmatpush3.bf16.msra.mxu1 %v1158_v56 }
 0x1eb   :  { %1061 = vmatprep.subr.bf16.mxu1 %v1173_v51 }
 0x1ee   :  { %1062 = vmatpush3.bf16.msra.mxu1 %v1159_v57 }
 0x1ef   :  { %1063 = vmatprep.subr.bf16.mxu1 %v1173_v51 }
 0x1f2   :  { %1064 = vmatpush3.bf16.msra.mxu1 %v1160_v2 }
 0x1f3   :  { %1065 = vmatprep.subr.bf16.mxu1 %v1173_v51  ;;  %v953_v51 = vld [vmem:[%s1536_s13] ss:$0 sm:$0xff] }
 0x1f6   :  { %1066 = vmatpush3.bf16.msra.mxu1 %v1161_v3 }
 0x299   :  { %v648_v59 = vpop.f32.mrf.mxu1 }
 0x29a   :  { %v649_v60 = vadd.f32 %v935_v58, %v648_v59 }
 0x29b   :  { %v1029_v61 = vpop.f32.mrf.mxu1 }
 0x29c   :  { %v654_v62 = vmax.f32 %v649_v60, 0.0 }
 0x29d   :  { %v651_v63 = vpop.f32.mrf.mxu1 }
 0x29e   :  { %v655_v0 = vpack.c.bf16 %v654_v62, %v654_v62 }
 0x29f   :  { %v1030_v1 = vpop.f32.mrf.mxu1 }
 0x2a0   :  { %1048 = vmatmul.mubr.bf16.vlgmr.msra.gmra.mxu0 %v655_v0 }
 0x360   :  { %v761_v5 = vpop.f32.mrf.mxu0 }
 0x361   :  { %v762_v6 = vadd.f32 %v944_v4, %v761_v5 }
 0x362   :  { %v1049_v7 = vpop.f32.mrf.mxu0 }
 0x363   :  { %v767_v8 = vmax.f32 %v762_v6, 0.0 }
 0x364   :  { %v764_v9 = vpop.f32.mrf.mxu0 }
 0x365   :  { %v768_v10 = vpack.c.bf16 %v767_v8, %v767_v8 }
 0x366   :  { %v1050_v11 = vpop.f32.mrf.mxu0 }
 0x367   :  { %1068 = vmatmul.mubr.bf16.vlgmr.msra.gmra.mxu1 %v768_v10 }
 0x427   :  { %v874_v12 = vpop.f32.mrf.mxu1 }
 0x428   :  { %v875_v13 = vadd.f32 %v953_v51, %v874_v12 }
 0x429   :  { %v1069_v14 = vpop.f32.mrf.mxu1 }
 0x42a   :  { %1170 = vtanh.f32 %v875_v13 }
 0x42b   :  { %v877_v15 = vpop.f32.mrf.mxu1 }
 0x42d   :  { %v1070_v16 = vpop.f32.mrf.mxu1 }
 0x437   :  { %v1171_v17 = vpop.eup %1170 }
 0x438   :  { %881 = vst [vmem:[%s1537_s14] sm:$0xff] %v1171_v17 }

</bundles_post_ra>
